<compile_context>
chip_gen: v7x
topology: tpu7x:2x2x1
jax: 0.10.0
libtpu: 0.0.40
codegen_flags: <defaults>
</compile_context>

<pallas_src>
import functools

import numpy as np

import jax
import jax.numpy as jnp
from jax.experimental import pallas as pl
from jax.experimental.pallas import tpu as pltpu


# ---------------------------------------------------------------------------
# In-kernel helpers
# ---------------------------------------------------------------------------
def _row_roll(v, s):
    """out[r] = v[(r - s) mod R] (jnp.roll semantics, static shift) via
    slice + concat so the lowering is unambiguous."""
    R = v.shape[0]
    s = s % R
    if s == 0:
        return v
    return jnp.concatenate([v[R - s:, :], v[:R - s, :]], axis=0)


def _make_dense_layer_kernel(G, D, H, W, Cgs, Cout):
    """Fused BN(affine) + ReLU + 3x3x3 SAME conv over G channel groups.

    Ref layout (per grid step = one batch element):
      x_g     : (D*H, W*Cg)        f32   lane-flattened activation of group g
      scale_g : (1,   W*Cg)        f32   BN scale, tiled over W
      bias_g  : (1,   W*Cg)        f32   BN bias,  tiled over W
      wb_g    : (9, W*Cg, W*Cout)  bf16  banded (kd,kh) weight matrices
      o       : (D*H, W*Cout)      f32   conv output (lane-dense, 128 lanes)
    """
    DH = D * H

    def kernel(*refs):
        x_refs = refs[0:G]
        s_refs = refs[G:2 * G]
        b_refs = refs[2 * G:3 * G]
        w_refs = refs[3 * G:4 * G]
        o_ref = refs[4 * G]

        acc = jnp.zeros((DH, W * Cout), jnp.float32)

        for g in range(G):
            WCg = W * Cgs[g]
            x = x_refs[g][...]                         # (DH, WCg) f32
            scale = s_refs[g][0, :]                    # (WCg,)
            bias = b_refs[g][0, :]
            f = jnp.maximum(x * scale + bias, 0.0)     # f32 BN + ReLU

            # Row-position iotas used to mask the implicit zero padding.
            h_pos = jax.lax.broadcasted_iota(
                jnp.int32, (D, H, WCg), 1).reshape(DH, WCg)
            r_pos = jax.lax.broadcasted_iota(jnp.int32, (DH, WCg), 0)

            for kh in range(3):
                if kh == 0:        # a[d, h-1]
                    fk = jnp.where(h_pos >= 1, _row_roll(f, 1), 0.0)
                elif kh == 1:      # a[d, h]
                    fk = f
                else:              # a[d, h+1]
                    fk = jnp.where(h_pos <= H - 2, _row_roll(f, -1), 0.0)

                for kd in range(3):
                    if kd == 0:    # a[d-1, ...]  (aligned +H row shift)
                        v = jnp.where(r_pos >= H, _row_roll(fk, H), 0.0)
                    elif kd == 1:  # a[d, ...]
                        v = fk
                    else:          # a[d+1, ...]  (aligned -H row shift)
                        v = jnp.where(r_pos < (D - 1) * H,
                                      _row_roll(fk, -H), 0.0)
                    acc = acc + jnp.dot(v.astype(jnp.bfloat16),
                                        w_refs[g][kd * 3 + kh],
                                        preferred_element_type=jnp.float32)

        o_ref[...] = acc.astype(o_ref.dtype)

    return kernel


# ---------------------------------------------------------------------------
# Banded weights: fold the 3 W-taps + all W output positions into one matrix
# ---------------------------------------------------------------------------
def _banded_weights(w, W):
    # w: (3, 3, 3, Cin, Cout) DHWIO  ->  B: (9, W*Cin, W*Cout) with
    # B[kd*3+kh, wi*Cin+ci, wo*Cout+co] = w[kd, kh, wi-wo+1, ci, co]
    # (taps falling outside [0, W) are the implicit zero pad).
    Cin, Cout = w.shape[3], w.shape[4]
    kw = np.arange(3)[:, None, None]
    wi = np.arange(W)[None, :, None]
    wo = np.arange(W)[None, None, :]
    band_np = (wi == wo - 1 + kw).astype(np.float32)          # (3, W, W)
    band = jnp.asarray(band_np, dtype=w.dtype)
    B = jnp.einsum('dhkio,kab->dhaibo', w, band)              # one einsum
    return B.reshape(9, W * Cin, W * Cout)


# ---------------------------------------------------------------------------
# _DenseLayer / _DenseBlock wrappers (channels-last feature groups)
# ---------------------------------------------------------------------------
def dense_layer(features, gamma, beta, w, *, eps=1e-5):
    """features: list of (N, D, H, W, Cg) f32 groups whose channel concat is the
    PyTorch layer input.  Returns only the new growth features (N,D,H,W,Cout)."""
    N, D, H, W, _ = features[0].shape
    Cout = w.shape[-1]
    Cgs = tuple(f.shape[-1] for f in features)
    G = len(features)
    DH = D * H

    x_args, s_args, b_args, w_args = [], [], [], []
    off = 0
    for feat, Cg in zip(features, Cgs):
        # Training-mode BatchNorm3d (biased batch variance), per channel group
        # (channels are disjoint, so per-group stats == stats of the concat).
        mean = jnp.mean(feat, axis=(0, 1, 2, 3))
        var = jnp.var(feat, axis=(0, 1, 2, 3))
        scale = gamma[off:off + Cg] * jax.lax.rsqrt(var + eps)
        bias = beta[off:off + Cg] - mean * scale

        x_args.append(feat.reshape(N, DH, W * Cg))            # lane = w*Cg + c
        s_args.append(jnp.tile(scale, W).reshape(1, W * Cg))
        b_args.append(jnp.tile(bias, W).reshape(1, W * Cg))
        w_args.append(_banded_weights(w[:, :, :, off:off + Cg, :], W)
                      .astype(jnp.bfloat16))                  # MXU operands bf16
        off += Cg

    kernel = _make_dense_layer_kernel(G, D, H, W, Cgs, Cout)

    in_specs = (
        [pl.BlockSpec((None, DH, W * Cg), lambda n: (n, 0, 0)) for Cg in Cgs]
        + [pl.BlockSpec((1, W * Cg), lambda n: (0, 0)) for Cg in Cgs]
        + [pl.BlockSpec((1, W * Cg), lambda n: (0, 0)) for Cg in Cgs]
        + [pl.BlockSpec((9, W * Cg, W * Cout), lambda n: (0, 0, 0)) for Cg in Cgs]
    )

    out_l = pl.pallas_call(
        kernel,
        out_shape=jax.ShapeDtypeStruct((N, DH, W * Cout), jnp.float32),
        grid=(N,),                                   # one step per batch element
        in_specs=in_specs,
        out_specs=pl.BlockSpec((None, DH, W * Cout), lambda n: (n, 0, 0)),
        compiler_params=pltpu.CompilerParams(
            dimension_semantics=("parallel",)),       # v7x: one core per batch elem
    )(*x_args, *s_args, *b_args, *w_args)

    return out_l.reshape(N, D, H, W, Cout)


def dense_block(x_ncdhw, params):
    # PyTorch boundary: NCDHW -> NDHWC, kept as a list of channel groups so the
    # growing activation is never re-concatenated / re-read between layers.
    x = jnp.transpose(x_ncdhw, (0, 2, 3, 4, 1))
    feats = [x]
    for gamma, beta, w in params:
        feats.append(dense_layer(feats, gamma, beta, w))
    # TODO(synk): write each layer's output directly into a preallocated
    # (N, D, H, (Cin+2g)*W) lane-flattened buffer via input_output_aliases +
    # channel-offset out_spec to drop even this final concat copy.
    out = jnp.concatenate(feats, axis=-1)             # [x | out1 | out2]
    return jnp.transpose(out, (0, 4, 1, 2, 3))        # back to NCDHW


# ---------------------------------------------------------------------------
# Deterministic parameter init (matches PyTorch module shapes / default init)
# ---------------------------------------------------------------------------
def init_params(key, in_channels, growth_rate):
    def one_layer(k, cin):
        gamma = jnp.ones((cin,), jnp.float32)          # BN weight default
        beta = jnp.zeros((cin,), jnp.float32)          # BN bias default
        fan_in = cin * 27
        bound = 1.0 / jnp.sqrt(jnp.float32(fan_in))    # kaiming_uniform(a=sqrt(5))
        w = jax.random.uniform(k, (3, 3, 3, cin, growth_rate),
                               jnp.float32, -bound, bound)   # DHWIO
        return gamma, beta, w

    k1, k2 = jax.random.split(key)
    p1 = one_layer(k1, in_channels)
    p2 = one_layer(k2, in_channels + growth_rate)
    return p1, p2


# ---------------------------------------------------------------------------
# Pure-JAX reference (correctness check)
# ---------------------------------------------------------------------------
def ref_dense_layer(x, gamma, beta, w, eps=1e-5):
    mean = jnp.mean(x, axis=(0, 1, 2, 3))
    var = jnp.var(x, axis=(0, 1, 2, 3))
    a = jnp.maximum((x - mean) * (gamma * jax.lax.rsqrt(var + eps)) + beta, 0.0)
    out = jax.lax.conv_general_dilated(
        a, w, window_strides=(1, 1, 1), padding="SAME",
        dimension_numbers=("NDHWC", "DHWIO", "NDHWC"))
    return jnp.concatenate([x, out], axis=-1)


def ref_dense_block(x_ncdhw, params):
    x = jnp.transpose(x_ncdhw, (0, 2, 3, 4, 1))
    (g1, b1, w1), (g2, b2, w2) = params
    x = ref_dense_layer(x, g1, b1, w1)
    x = ref_dense_layer(x, g2, b2, w2)
    return jnp.transpose(x, (0, 4, 1, 2, 3))


# ---------------------------------------------------------------------------
if __name__ == "__main__":
    key = jax.random.PRNGKey(0)
    kx, kp = jax.random.split(key)

    N, Cin, D, H, W = 2, 4, 8, 8, 8
    growth_rate = 16

    x = jax.random.normal(kx, (N, Cin, D, H, W), jnp.float32)   # NCDHW like PyTorch
    params = init_params(kp, Cin, growth_rate)

    out = jax.jit(functools.partial(dense_block, params=params))(x)
    out = jax.block_until_ready(out)

    expected_shape = (N, Cin + 2 * growth_rate, D, H, W)
    assert out.shape == expected_shape, (out.shape, expected_shape)

    ref = ref_dense_block(x, params)
    max_err = float(jnp.max(jnp.abs(out - ref)))
    # bf16 MXU operands with f32 accumulation -> absolute error of a few 1e-3.
    assert jnp.allclose(out, ref, rtol=3e-2, atol=3e-2), max_err

    print("KERNEL_OK")
</pallas_src>

<mosaic_0001>
module attributes {stable_mosaic.version = 11 : i64} {
  func.func @kernel(%arg0: i32, %arg1: memref<1x64x32xf32, #tpu.memory_space<vmem>>, %arg2: memref<1x32xf32, #tpu.memory_space<vmem>>, %arg3: memref<1x32xf32, #tpu.memory_space<vmem>>, %arg4: memref<9x32x128xbf16, #tpu.memory_space<vmem>>, %arg5: memref<1x64x128xf32, #tpu.memory_space<vmem>>) attributes {dimension_semantics = [#tpu.dimension_semantics<parallel>], iteration_bounds = array<i64: 2>, scalar_prefetch = 0 : i64, scratch_operands = 0 : i64, tpu.core_type = #tpu.core_type<tc>, window_params = [{transform_indices = @transform_0, window_bounds = array<i64: 1, 64, 32>}, {pipeline_mode = #tpu.pipeline_mode<synchronous>, transform_indices = @transform_1, window_bounds = array<i64: 1, 32>}, {pipeline_mode = #tpu.pipeline_mode<synchronous>, transform_indices = @transform_2, window_bounds = array<i64: 1, 32>}, {pipeline_mode = #tpu.pipeline_mode<synchronous>, transform_indices = @transform_3, window_bounds = array<i64: 9, 32, 128>}, {transform_indices = @transform_4, window_bounds = array<i64: 1, 64, 128>}]} {
    %cst = arith.constant 0.000000e+00 : f32
    %0 = vector.broadcast %cst : f32 to vector<64x128xf32>
    %c0 = arith.constant 0 : index
    %c0_0 = arith.constant 0 : index
    %c0_1 = arith.constant 0 : index
    %1 = vector.load %arg1[%c0, %c0_0, %c0_1] : memref<1x64x32xf32, #tpu.memory_space<vmem>>, vector<1x64x32xf32>
    %2 = vector.shape_cast %1 : vector<1x64x32xf32> to vector<64x32xf32>
    %c0_2 = arith.constant 0 : index
    %c0_3 = arith.constant 0 : index
    %3 = vector.load %arg2[%c0_2, %c0_3] : memref<1x32xf32, #tpu.memory_space<vmem>>, vector<1x32xf32>
    %4 = vector.shape_cast %3 : vector<1x32xf32> to vector<32xf32>
    %c0_4 = arith.constant 0 : index
    %c0_5 = arith.constant 0 : index
    %5 = vector.load %arg3[%c0_4, %c0_5] : memref<1x32xf32, #tpu.memory_space<vmem>>, vector<1x32xf32>
    %6 = vector.shape_cast %5 : vector<1x32xf32> to vector<32xf32>
    %7 = vector.shape_cast %4 : vector<32xf32> to vector<1x32xf32>
    %8 = vector.broadcast %7 : vector<1x32xf32> to vector<64x32xf32>
    %9 = arith.mulf %2, %8 : vector<64x32xf32>
    %10 = vector.shape_cast %6 : vector<32xf32> to vector<1x32xf32>
    %11 = vector.broadcast %10 : vector<1x32xf32> to vector<64x32xf32>
    %12 = arith.addf %9, %11 : vector<64x32xf32>
    %cst_6 = arith.constant 0.000000e+00 : f32
    %13 = vector.broadcast %cst_6 : f32 to vector<64x32xf32>
    %14 = arith.maximumf %12, %13 : vector<64x32xf32>
    %15 = tpu.iota {dimensions = array<i32: 1>} : vector<8x8x32xi32>
    %16 = vector.shape_cast %15 : vector<8x8x32xi32> to vector<64x32xi32>
    %17 = tpu.iota {dimensions = array<i32: 0>} : vector<64x32xi32>
    %c1_i32 = arith.constant 1 : i32
    %18 = vector.broadcast %c1_i32 : i32 to vector<64x32xi32>
    %19 = arith.cmpi sge, %16, %18 : vector<64x32xi32>
    %20 = vector.extract_strided_slice %14 {offsets = [63, 0], sizes = [1, 32], strides = [1, 1]} : vector<64x32xf32> to vector<1x32xf32>
    %21 = vector.extract_strided_slice %14 {offsets = [0, 0], sizes = [63, 32], strides = [1, 1]} : vector<64x32xf32> to vector<63x32xf32>
    %22 = tpu.concatenate %20, %21 in 0 : vector<1x32xf32>, vector<63x32xf32> -> vector<64x32xf32>
    %cst_7 = arith.constant 0.000000e+00 : f32
    %23 = vector.broadcast %cst_7 : f32 to vector<64x32xf32>
    %24 = arith.select %19, %22, %23 : vector<64x32xi1>, vector<64x32xf32>
    %c8_i32 = arith.constant 8 : i32
    %25 = vector.broadcast %c8_i32 : i32 to vector<64x32xi32>
    %26 = arith.cmpi sge, %17, %25 : vector<64x32xi32>
    %27 = vector.extract_strided_slice %24 {offsets = [56, 0], sizes = [8, 32], strides = [1, 1]} : vector<64x32xf32> to vector<8x32xf32>
    %28 = vector.extract_strided_slice %24 {offsets = [0, 0], sizes = [56, 32], strides = [1, 1]} : vector<64x32xf32> to vector<56x32xf32>
    %29 = tpu.concatenate %27, %28 in 0 : vector<8x32xf32>, vector<56x32xf32> -> vector<64x32xf32>
    %cst_8 = arith.constant 0.000000e+00 : f32
    %30 = vector.broadcast %cst_8 : f32 to vector<64x32xf32>
    %31 = arith.select %26, %29, %30 : vector<64x32xi1>, vector<64x32xf32>
    %32 = arith.truncf %31 : vector<64x32xf32> to vector<64x32xbf16>
    %c0_9 = arith.constant 0 : index
    %c0_10 = arith.constant 0 : index
    %c0_11 = arith.constant 0 : index
    %33 = vector.load %arg4[%c0_9, %c0_10, %c0_11] : memref<9x32x128xbf16, #tpu.memory_space<vmem>>, vector<1x32x128xbf16>
    %34 = vector.shape_cast %33 : vector<1x32x128xbf16> to vector<32x128xbf16>
    %cst_12 = arith.constant dense<0.000000e+00> : vector<64x128xf32>
    %35 = tpu.matmul %32, %34, %cst_12 {dimension_numbers = #tpu.dot_dimension_numbers<[1], [0], [0], [1], [0, 0, 1, 1], [], []>} : vector<64x32xbf16>, vector<32x128xbf16>, vector<64x128xf32> -> vector<64x128xf32>
    %36 = arith.addf %0, %35 : vector<64x128xf32>
    %37 = arith.truncf %24 : vector<64x32xf32> to vector<64x32xbf16>
    %c3 = arith.constant 3 : index
    %c0_13 = arith.constant 0 : index
    %c0_14 = arith.constant 0 : index
    %38 = vector.load %arg4[%c3, %c0_13, %c0_14] : memref<9x32x128xbf16, #tpu.memory_space<vmem>>, vector<1x32x128xbf16>
    %39 = vector.shape_cast %38 : vector<1x32x128xbf16> to vector<32x128xbf16>
    %cst_15 = arith.constant dense<0.000000e+00> : vector<64x128xf32>
    %40 = tpu.matmul %37, %39, %cst_15 {dimension_numbers = #tpu.dot_dimension_numbers<[1], [0], [0], [1], [0, 0, 1, 1], [], []>} : vector<64x32xbf16>, vector<32x128xbf16>, vector<64x128xf32> -> vector<64x128xf32>
    %41 = arith.addf %36, %40 : vector<64x128xf32>
    %c56_i32 = arith.constant 56 : i32
    %42 = vector.broadcast %c56_i32 : i32 to vector<64x32xi32>
    %43 = arith.cmpi slt, %17, %42 : vector<64x32xi32>
    %44 = vector.extract_strided_slice %24 {offsets = [8, 0], sizes = [56, 32], strides = [1, 1]} : vector<64x32xf32> to vector<56x32xf32>
    %45 = vector.extract_strided_slice %24 {offsets = [0, 0], sizes = [8, 32], strides = [1, 1]} : vector<64x32xf32> to vector<8x32xf32>
    %46 = tpu.concatenate %44, %45 in 0 : vector<56x32xf32>, vector<8x32xf32> -> vector<64x32xf32>
    %cst_16 = arith.constant 0.000000e+00 : f32
    %47 = vector.broadcast %cst_16 : f32 to vector<64x32xf32>
    %48 = arith.select %43, %46, %47 : vector<64x32xi1>, vector<64x32xf32>
    %49 = arith.truncf %48 : vector<64x32xf32> to vector<64x32xbf16>
    %c6 = arith.constant 6 : index
    %c0_17 = arith.constant 0 : index
    %c0_18 = arith.constant 0 : index
    %50 = vector.load %arg4[%c6, %c0_17, %c0_18] : memref<9x32x128xbf16, #tpu.memory_space<vmem>>, vector<1x32x128xbf16>
    %51 = vector.shape_cast %50 : vector<1x32x128xbf16> to vector<32x128xbf16>
    %cst_19 = arith.constant dense<0.000000e+00> : vector<64x128xf32>
    %52 = tpu.matmul %49, %51, %cst_19 {dimension_numbers = #tpu.dot_dimension_numbers<[1], [0], [0], [1], [0, 0, 1, 1], [], []>} : vector<64x32xbf16>, vector<32x128xbf16>, vector<64x128xf32> -> vector<64x128xf32>
    %53 = arith.addf %41, %52 : vector<64x128xf32>
    %c8_i32_20 = arith.constant 8 : i32
    %54 = vector.broadcast %c8_i32_20 : i32 to vector<64x32xi32>
    %55 = arith.cmpi sge, %17, %54 : vector<64x32xi32>
    %56 = vector.extract_strided_slice %14 {offsets = [56, 0], sizes = [8, 32], strides = [1, 1]} : vector<64x32xf32> to vector<8x32xf32>
    %57 = vector.extract_strided_slice %14 {offsets = [0, 0], sizes = [56, 32], strides = [1, 1]} : vector<64x32xf32> to vector<56x32xf32>
    %58 = tpu.concatenate %56, %57 in 0 : vector<8x32xf32>, vector<56x32xf32> -> vector<64x32xf32>
    %cst_21 = arith.constant 0.000000e+00 : f32
    %59 = vector.broadcast %cst_21 : f32 to vector<64x32xf32>
    %60 = arith.select %55, %58, %59 : vector<64x32xi1>, vector<64x32xf32>
    %61 = arith.truncf %60 : vector<64x32xf32> to vector<64x32xbf16>
    %c1 = arith.constant 1 : index
    %c0_22 = arith.constant 0 : index
    %c0_23 = arith.constant 0 : index
    %62 = vector.load %arg4[%c1, %c0_22, %c0_23] : memref<9x32x128xbf16, #tpu.memory_space<vmem>>, vector<1x32x128xbf16>
    %63 = vector.shape_cast %62 : vector<1x32x128xbf16> to vector<32x128xbf16>
    %cst_24 = arith.constant dense<0.000000e+00> : vector<64x128xf32>
    %64 = tpu.matmul %61, %63, %cst_24 {dimension_numbers = #tpu.dot_dimension_numbers<[1], [0], [0], [1], [0, 0, 1, 1], [], []>} : vector<64x32xbf16>, vector<32x128xbf16>, vector<64x128xf32> -> vector<64x128xf32>
    %65 = arith.addf %53, %64 : vector<64x128xf32>
    %66 = arith.truncf %14 : vector<64x32xf32> to vector<64x32xbf16>
    %c4 = arith.constant 4 : index
    %c0_25 = arith.constant 0 : index
    %c0_26 = arith.constant 0 : index
    %67 = vector.load %arg4[%c4, %c0_25, %c0_26] : memref<9x32x128xbf16, #tpu.memory_space<vmem>>, vector<1x32x128xbf16>
    %68 = vector.shape_cast %67 : vector<1x32x128xbf16> to vector<32x128xbf16>
    %cst_27 = arith.constant dense<0.000000e+00> : vector<64x128xf32>
    %69 = tpu.matmul %66, %68, %cst_27 {dimension_numbers = #tpu.dot_dimension_numbers<[1], [0], [0], [1], [0, 0, 1, 1], [], []>} : vector<64x32xbf16>, vector<32x128xbf16>, vector<64x128xf32> -> vector<64x128xf32>
    %70 = arith.addf %65, %69 : vector<64x128xf32>
    %c56_i32_28 = arith.constant 56 : i32
    %71 = vector.broadcast %c56_i32_28 : i32 to vector<64x32xi32>
    %72 = arith.cmpi slt, %17, %71 : vector<64x32xi32>
    %73 = vector.extract_strided_slice %14 {offsets = [8, 0], sizes = [56, 32], strides = [1, 1]} : vector<64x32xf32> to vector<56x32xf32>
    %74 = vector.extract_strided_slice %14 {offsets = [0, 0], sizes = [8, 32], strides = [1, 1]} : vector<64x32xf32> to vector<8x32xf32>
    %75 = tpu.concatenate %73, %74 in 0 : vector<56x32xf32>, vector<8x32xf32> -> vector<64x32xf32>
    %cst_29 = arith.constant 0.000000e+00 : f32
    %76 = vector.broadcast %cst_29 : f32 to vector<64x32xf32>
    %77 = arith.select %72, %75, %76 : vector<64x32xi1>, vector<64x32xf32>
    %78 = arith.truncf %77 : vector<64x32xf32> to vector<64x32xbf16>
    %c7 = arith.constant 7 : index
    %c0_30 = arith.constant 0 : index
    %c0_31 = arith.constant 0 : index
    %79 = vector.load %arg4[%c7, %c0_30, %c0_31] : memref<9x32x128xbf16, #tpu.memory_space<vmem>>, vector<1x32x128xbf16>
    %80 = vector.shape_cast %79 : vector<1x32x128xbf16> to vector<32x128xbf16>
    %cst_32 = arith.constant dense<0.000000e+00> : vector<64x128xf32>
    %81 = tpu.matmul %78, %80, %cst_32 {dimension_numbers = #tpu.dot_dimension_numbers<[1], [0], [0], [1], [0, 0, 1, 1], [], []>} : vector<64x32xbf16>, vector<32x128xbf16>, vector<64x128xf32> -> vector<64x128xf32>
    %82 = arith.addf %70, %81 : vector<64x128xf32>
    %c6_i32 = arith.constant 6 : i32
    %83 = vector.broadcast %c6_i32 : i32 to vector<64x32xi32>
    %84 = arith.cmpi sle, %16, %83 : vector<64x32xi32>
    %85 = vector.extract_strided_slice %14 {offsets = [1, 0], sizes = [63, 32], strides = [1, 1]} : vector<64x32xf32> to vector<63x32xf32>
    %86 = vector.extract_strided_slice %14 {offsets = [0, 0], sizes = [1, 32], strides = [1, 1]} : vector<64x32xf32> to vector<1x32xf32>
    %87 = tpu.concatenate %85, %86 in 0 : vector<63x32xf32>, vector<1x32xf32> -> vector<64x32xf32>
    %cst_33 = arith.constant 0.000000e+00 : f32
    %88 = vector.broadcast %cst_33 : f32 to vector<64x32xf32>
    %89 = arith.select %84, %87, %88 : vector<64x32xi1>, vector<64x32xf32>
    %c8_i32_34 = arith.constant 8 : i32
    %90 = vector.broadcast %c8_i32_34 : i32 to vector<64x32xi32>
    %91 = arith.cmpi sge, %17, %90 : vector<64x32xi32>
    %92 = vector.extract_strided_slice %89 {offsets = [56, 0], sizes = [8, 32], strides = [1, 1]} : vector<64x32xf32> to vector<8x32xf32>
    %93 = vector.extract_strided_slice %89 {offsets = [0, 0], sizes = [56, 32], strides = [1, 1]} : vector<64x32xf32> to vector<56x32xf32>
    %94 = tpu.concatenate %92, %93 in 0 : vector<8x32xf32>, vector<56x32xf32> -> vector<64x32xf32>
    %cst_35 = arith.constant 0.000000e+00 : f32
    %95 = vector.broadcast %cst_35 : f32 to vector<64x32xf32>
    %96 = arith.select %91, %94, %95 : vector<64x32xi1>, vector<64x32xf32>
    %97 = arith.truncf %96 : vector<64x32xf32> to vector<64x32xbf16>
    %c2 = arith.constant 2 : index
    %c0_36 = arith.constant 0 : index
    %c0_37 = arith.constant 0 : index
    %98 = vector.load %arg4[%c2, %c0_36, %c0_37] : memref<9x32x128xbf16, #tpu.memory_space<vmem>>, vector<1x32x128xbf16>
    %99 = vector.shape_cast %98 : vector<1x32x128xbf16> to vector<32x128xbf16>
    %cst_38 = arith.constant dense<0.000000e+00> : vector<64x128xf32>
    %100 = tpu.matmul %97, %99, %cst_38 {dimension_numbers = #tpu.dot_dimension_numbers<[1], [0], [0], [1], [0, 0, 1, 1], [], []>} : vector<64x32xbf16>, vector<32x128xbf16>, vector<64x128xf32> -> vector<64x128xf32>
    %101 = arith.addf %82, %100 : vector<64x128xf32>
    %102 = arith.truncf %89 : vector<64x32xf32> to vector<64x32xbf16>
    %c5 = arith.constant 5 : index
    %c0_39 = arith.constant 0 : index
    %c0_40 = arith.constant 0 : index
    %103 = vector.load %arg4[%c5, %c0_39, %c0_40] : memref<9x32x128xbf16, #tpu.memory_space<vmem>>, vector<1x32x128xbf16>
    %104 = vector.shape_cast %103 : vector<1x32x128xbf16> to vector<32x128xbf16>
    %cst_41 = arith.constant dense<0.000000e+00> : vector<64x128xf32>
    %105 = tpu.matmul %102, %104, %cst_41 {dimension_numbers = #tpu.dot_dimension_numbers<[1], [0], [0], [1], [0, 0, 1, 1], [], []>} : vector<64x32xbf16>, vector<32x128xbf16>, vector<64x128xf32> -> vector<64x128xf32>
    %106 = arith.addf %101, %105 : vector<64x128xf32>
    %c56_i32_42 = arith.constant 56 : i32
    %107 = vector.broadcast %c56_i32_42 : i32 to vector<64x32xi32>
    %108 = arith.cmpi slt, %17, %107 : vector<64x32xi32>
    %109 = vector.extract_strided_slice %89 {offsets = [8, 0], sizes = [56, 32], strides = [1, 1]} : vector<64x32xf32> to vector<56x32xf32>
    %110 = vector.extract_strided_slice %89 {offsets = [0, 0], sizes = [8, 32], strides = [1, 1]} : vector<64x32xf32> to vector<8x32xf32>
    %111 = tpu.concatenate %109, %110 in 0 : vector<56x32xf32>, vector<8x32xf32> -> vector<64x32xf32>
    %cst_43 = arith.constant 0.000000e+00 : f32
    %112 = vector.broadcast %cst_43 : f32 to vector<64x32xf32>
    %113 = arith.select %108, %111, %112 : vector<64x32xi1>, vector<64x32xf32>
    %114 = arith.truncf %113 : vector<64x32xf32> to vector<64x32xbf16>
    %c8 = arith.constant 8 : index
    %c0_44 = arith.constant 0 : index
    %c0_45 = arith.constant 0 : index
    %115 = vector.load %arg4[%c8, %c0_44, %c0_45] : memref<9x32x128xbf16, #tpu.memory_space<vmem>>, vector<1x32x128xbf16>
    %116 = vector.shape_cast %115 : vector<1x32x128xbf16> to vector<32x128xbf16>
    %cst_46 = arith.constant dense<0.000000e+00> : vector<64x128xf32>
    %117 = tpu.matmul %114, %116, %cst_46 {dimension_numbers = #tpu.dot_dimension_numbers<[1], [0], [0], [1], [0, 0, 1, 1], [], []>} : vector<64x32xbf16>, vector<32x128xbf16>, vector<64x128xf32> -> vector<64x128xf32>
    %118 = arith.addf %106, %117 : vector<64x128xf32>
    %c0_47 = arith.constant 0 : index
    %c0_48 = arith.constant 0 : index
    %c0_49 = arith.constant 0 : index
    %119 = vector.load %arg5[%c0_47, %c0_48, %c0_49] : memref<1x64x128xf32, #tpu.memory_space<vmem>>, vector<1x64x128xf32>
    %120 = vector.shape_cast %119 : vector<1x64x128xf32> to vector<64x128xf32>
    %121 = vector.shape_cast %118 : vector<64x128xf32> to vector<1x64x128xf32>
    tpu.vector_store %arg5[%c0_47, %c0_48, %c0_49], %121 {strides = array<i32>} : memref<1x64x128xf32, #tpu.memory_space<vmem>>, vector<1x64x128xf32>,
    return
  }
  func.func @transform_0(%arg0: i32) -> (i32, i32, i32) {
    %c0_i32 = arith.constant 0 : i32
    %c0_i32_0 = arith.constant 0 : i32
    %c0_i32_1 = arith.constant 0 : i32
    return %arg0, %c0_i32, %c0_i32_0 : i32, i32, i32
  }
  func.func @transform_1(%arg0: i32) -> (i32, i32) {
    %c0_i32 = arith.constant 0 : i32
    %c0_i32_0 = arith.constant 0 : i32
    %c0_i32_1 = arith.constant 0 : i32
    return %c0_i32, %c0_i32_0 : i32, i32
  }
  func.func @transform_2(%arg0: i32) -> (i32, i32) {
    %c0_i32 = arith.constant 0 : i32
    %c0_i32_0 = arith.constant 0 : i32
    %c0_i32_1 = arith.constant 0 : i32
    return %c0_i32, %c0_i32_0 : i32, i32
  }
  func.func @transform_3(%arg0: i32) -> (i32, i32, i32) {
    %c0_i32 = arith.constant 0 : i32
    %c0_i32_0 = arith.constant 0 : i32
    %c0_i32_1 = arith.constant 0 : i32
    %c0_i32_2 = arith.constant 0 : i32
    return %c0_i32, %c0_i32_0, %c0_i32_1 : i32, i32, i32
  }
  func.func @transform_4(%arg0: i32) -> (i32, i32, i32) {
    %c0_i32 = arith.constant 0 : i32
    %c0_i32_0 = arith.constant 0 : i32
    %c0_i32_1 = arith.constant 0 : i32
    return %arg0, %c0_i32, %c0_i32_0 : i32, i32, i32
  }
}

module attributes {stable_mosaic.version = 11 : i64} {
  func.func @kernel(%arg0: i32, %arg1: memref<1x64x32xf32, #tpu.memory_space<vmem>>, %arg2: memref<1x64x128xf32, #tpu.memory_space<vmem>>, %arg3: memref<1x32xf32, #tpu.memory_space<vmem>>, %arg4: memref<1x128xf32, #tpu.memory_space<vmem>>, %arg5: memref<1x32xf32, #tpu.memory_space<vmem>>, %arg6: memref<1x128xf32, #tpu.memory_space<vmem>>, %arg7: memref<9x32x128xbf16, #tpu.memory_space<vmem>>, %arg8: memref<9x128x128xbf16, #tpu.memory_space<vmem>>, %arg9: memref<1x64x128xf32, #tpu.memory_space<vmem>>) attributes {dimension_semantics = [#tpu.dimension_semantics<parallel>], iteration_bounds = array<i64: 2>, scalar_prefetch = 0 : i64, scratch_operands = 0 : i64, tpu.core_type = #tpu.core_type<tc>, window_params = [{transform_indices = @transform_0, window_bounds = array<i64: 1, 64, 32>}, {transform_indices = @transform_1, window_bounds = array<i64: 1, 64, 128>}, {pipeline_mode = #tpu.pipeline_mode<synchronous>, transform_indices = @transform_2, window_bounds = array<i64: 1, 32>}, {pipeline_mode = #tpu.pipeline_mode<synchronous>, transform_indices = @transform_3, window_bounds = array<i64: 1, 128>}, {pipeline_mode = #tpu.pipeline_mode<synchronous>, transform_indices = @transform_4, window_bounds = array<i64: 1, 32>}, {pipeline_mode = #tpu.pipeline_mode<synchronous>, transform_indices = @transform_5, window_bounds = array<i64: 1, 128>}, {pipeline_mode = #tpu.pipeline_mode<synchronous>, transform_indices = @transform_6, window_bounds = array<i64: 9, 32, 128>}, {pipeline_mode = #tpu.pipeline_mode<synchronous>, transform_indices = @transform_7, window_bounds = array<i64: 9, 128, 128>}, {transform_indices = @transform_8, window_bounds = array<i64: 1, 64, 128>}]} {
    %cst = arith.constant 0.000000e+00 : f32
    %0 = vector.broadcast %cst : f32 to vector<64x128xf32>
    %c0 = arith.constant 0 : index
    %c0_0 = arith.constant 0 : index
    %c0_1 = arith.constant 0 : index
    %1 = vector.load %arg1[%c0, %c0_0, %c0_1] : memref<1x64x32xf32, #tpu.memory_space<vmem>>, vector<1x64x32xf32>
    %2 = vector.shape_cast %1 : vector<1x64x32xf32> to vector<64x32xf32>
    %c0_2 = arith.constant 0 : index
    %c0_3 = arith.constant 0 : index
    %3 = vector.load %arg3[%c0_2, %c0_3] : memref<1x32xf32, #tpu.memory_space<vmem>>, vector<1x32xf32>
    %4 = vector.shape_cast %3 : vector<1x32xf32> to vector<32xf32>
    %c0_4 = arith.constant 0 : index
    %c0_5 = arith.constant 0 : index
    %5 = vector.load %arg5[%c0_4, %c0_5] : memref<1x32xf32, #tpu.memory_space<vmem>>, vector<1x32xf32>
    %6 = vector.shape_cast %5 : vector<1x32xf32> to vector<32xf32>
    %7 = vector.shape_cast %4 : vector<32xf32> to vector<1x32xf32>
    %8 = vector.broadcast %7 : vector<1x32xf32> to vector<64x32xf32>
    %9 = arith.mulf %2, %8 : vector<64x32xf32>
    %10 = vector.shape_cast %6 : vector<32xf32> to vector<1x32xf32>
    %11 = vector.broadcast %10 : vector<1x32xf32> to vector<64x32xf32>
    %12 = arith.addf %9, %11 : vector<64x32xf32>
    %cst_6 = arith.constant 0.000000e+00 : f32
    %13 = vector.broadcast %cst_6 : f32 to vector<64x32xf32>
    %14 = arith.maximumf %12, %13 : vector<64x32xf32>
    %15 = tpu.iota {dimensions = array<i32: 1>} : vector<8x8x32xi32>
    %16 = vector.shape_cast %15 : vector<8x8x32xi32> to vector<64x32xi32>
    %17 = tpu.iota {dimensions = array<i32: 0>} : vector<64x32xi32>
    %c1_i32 = arith.constant 1 : i32
    %18 = vector.broadcast %c1_i32 : i32 to vector<64x32xi32>
    %19 = arith.cmpi sge, %16, %18 : vector<64x32xi32>
    %20 = vector.extract_strided_slice %14 {offsets = [63, 0], sizes = [1, 32], strides = [1, 1]} : vector<64x32xf32> to vector<1x32xf32>
    %21 = vector.extract_strided_slice %14 {offsets = [0, 0], sizes = [63, 32], strides = [1, 1]} : vector<64x32xf32> to vector<63x32xf32>
    %22 = tpu.concatenate %20, %21 in 0 : vector<1x32xf32>, vector<63x32xf32> -> vector<64x32xf32>
    %cst_7 = arith.constant 0.000000e+00 : f32
    %23 = vector.broadcast %cst_7 : f32 to vector<64x32xf32>
    %24 = arith.select %19, %22, %23 : vector<64x32xi1>, vector<64x32xf32>
    %c8_i32 = arith.constant 8 : i32
    %25 = vector.broadcast %c8_i32 : i32 to vector<64x32xi32>
    %26 = arith.cmpi sge, %17, %25 : vector<64x32xi32>
    %27 = vector.extract_strided_slice %24 {offsets = [56, 0], sizes = [8, 32], strides = [1, 1]} : vector<64x32xf32> to vector<8x32xf32>
    %28 = vector.extract_strided_slice %24 {offsets = [0, 0], sizes = [56, 32], strides = [1, 1]} : vector<64x32xf32> to vector<56x32xf32>
    %29 = tpu.concatenate %27, %28 in 0 : vector<8x32xf32>, vector<56x32xf32> -> vector<64x32xf32>
    %cst_8 = arith.constant 0.000000e+00 : f32
    %30 = vector.broadcast %cst_8 : f32 to vector<64x32xf32>
    %31 = arith.select %26, %29, %30 : vector<64x32xi1>, vector<64x32xf32>
    %32 = arith.truncf %31 : vector<64x32xf32> to vector<64x32xbf16>
    %c0_9 = arith.constant 0 : index
    %c0_10 = arith.constant 0 : index
    %c0_11 = arith.constant 0 : index
    %33 = vector.load %arg7[%c0_9, %c0_10, %c0_11] : memref<9x32x128xbf16, #tpu.memory_space<vmem>>, vector<1x32x128xbf16>
    %34 = vector.shape_cast %33 : vector<1x32x128xbf16> to vector<32x128xbf16>
    %cst_12 = arith.constant dense<0.000000e+00> : vector<64x128xf32>
    %35 = tpu.matmul %32, %34, %cst_12 {dimension_numbers = #tpu.dot_dimension_numbers<[1], [0], [0], [1], [0, 0, 1, 1], [], []>} : vector<64x32xbf16>, vector<32x128xbf16>, vector<64x128xf32> -> vector<64x128xf32>
    %36 = arith.addf %0, %35 : vector<64x128xf32>
    %37 = arith.truncf %24 : vector<64x32xf32> to vector<64x32xbf16>
    %c3 = arith.constant 3 : index
    %c0_13 = arith.constant 0 : index
    %c0_14 = arith.constant 0 : index
    %38 = vector.load %arg7[%c3, %c0_13, %c0_14] : memref<9x32x128xbf16, #tpu.memory_space<vmem>>, vector<1x32x128xbf16>
    %39 = vector.shape_cast %38 : vector<1x32x128xbf16> to vector<32x128xbf16>
    %cst_15 = arith.constant dense<0.000000e+00> : vector<64x128xf32>
    %40 = tpu.matmul %37, %39, %cst_15 {dimension_numbers = #tpu.dot_dimension_numbers<[1], [0], [0], [1], [0, 0, 1, 1], [], []>} : vector<64x32xbf16>, vector<32x128xbf16>, vector<64x128xf32> -> vector<64x128xf32>
    %41 = arith.addf %36, %40 : vector<64x128xf32>
    %c56_i32 = arith.constant 56 : i32
    %42 = vector.broadcast %c56_i32 : i32 to vector<64x32xi32>
    %43 = arith.cmpi slt, %17, %42 : vector<64x32xi32>
    %44 = vector.extract_strided_slice %24 {offsets = [8, 0], sizes = [56, 32], strides = [1, 1]} : vector<64x32xf32> to vector<56x32xf32>
    %45 = vector.extract_strided_slice %24 {offsets = [0, 0], sizes = [8, 32], strides = [1, 1]} : vector<64x32xf32> to vector<8x32xf32>
    %46 = tpu.concatenate %44, %45 in 0 : vector<56x32xf32>, vector<8x32xf32> -> vector<64x32xf32>
    %cst_16 = arith.constant 0.000000e+00 : f32
    %47 = vector.broadcast %cst_16 : f32 to vector<64x32xf32>
    %48 = arith.select %43, %46, %47 : vector<64x32xi1>, vector<64x32xf32>
    %49 = arith.truncf %48 : vector<64x32xf32> to vector<64x32xbf16>
    %c6 = arith.constant 6 : index
    %c0_17 = arith.constant 0 : index
    %c0_18 = arith.constant 0 : index
    %50 = vector.load %arg7[%c6, %c0_17, %c0_18] : memref<9x32x128xbf16, #tpu.memory_space<vmem>>, vector<1x32x128xbf16>
    %51 = vector.shape_cast %50 : vector<1x32x128xbf16> to vector<32x128xbf16>
    %cst_19 = arith.constant dense<0.000000e+00> : vector<64x128xf32>
    %52 = tpu.matmul %49, %51, %cst_19 {dimension_numbers = #tpu.dot_dimension_numbers<[1], [0], [0], [1], [0, 0, 1, 1], [], []>} : vector<64x32xbf16>, vector<32x128xbf16>, vector<64x128xf32> -> vector<64x128xf32>
    %53 = arith.addf %41, %52 : vector<64x128xf32>
    %c8_i32_20 = arith.constant 8 : i32
    %54 = vector.broadcast %c8_i32_20 : i32 to vector<64x32xi32>
    %55 = arith.cmpi sge, %17, %54 : vector<64x32xi32>
    %56 = vector.extract_strided_slice %14 {offsets = [56, 0], sizes = [8, 32], strides = [1, 1]} : vector<64x32xf32> to vector<8x32xf32>
    %57 = vector.extract_strided_slice %14 {offsets = [0, 0], sizes = [56, 32], strides = [1, 1]} : vector<64x32xf32> to vector<56x32xf32>
    %58 = tpu.concatenate %56, %57 in 0 : vector<8x32xf32>, vector<56x32xf32> -> vector<64x32xf32>
    %cst_21 = arith.constant 0.000000e+00 : f32
    %59 = vector.broadcast %cst_21 : f32 to vector<64x32xf32>
    %60 = arith.select %55, %58, %59 : vector<64x32xi1>, vector<64x32xf32>
    %61 = arith.truncf %60 : vector<64x32xf32> to vector<64x32xbf16>
    %c1 = arith.constant 1 : index
    %c0_22 = arith.constant 0 : index
    %c0_23 = arith.constant 0 : index
    %62 = vector.load %arg7[%c1, %c0_22, %c0_23] : memref<9x32x128xbf16, #tpu.memory_space<vmem>>, vector<1x32x128xbf16>
    %63 = vector.shape_cast %62 : vector<1x32x128xbf16> to vector<32x128xbf16>
    %cst_24 = arith.constant dense<0.000000e+00> : vector<64x128xf32>
    %64 = tpu.matmul %61, %63, %cst_24 {dimension_numbers = #tpu.dot_dimension_numbers<[1], [0], [0], [1], [0, 0, 1, 1], [], []>} : vector<64x32xbf16>, vector<32x128xbf16>, vector<64x128xf32> -> vector<64x128xf32>
    %65 = arith.addf %53, %64 : vector<64x128xf32>
    %66 = arith.truncf %14 : vector<64x32xf32> to vector<64x32xbf16>
    %c4 = arith.constant 4 : index
    %c0_25 = arith.constant 0 : index
    %c0_26 = arith.constant 0 : index
    %67 = vector.load %arg7[%c4, %c0_25, %c0_26] : memref<9x32x128xbf16, #tpu.memory_space<vmem>>, vector<1x32x128xbf16>
    %68 = vector.shape_cast %67 : vector<1x32x128xbf16> to vector<32x128xbf16>
    %cst_27 = arith.constant dense<0.000000e+00> : vector<64x128xf32>
    %69 = tpu.matmul %66, %68, %cst_27 {dimension_numbers = #tpu.dot_dimension_numbers<[1], [0], [0], [1], [0, 0, 1, 1], [], []>} : vector<64x32xbf16>, vector<32x128xbf16>, vector<64x128xf32> -> vector<64x128xf32>
    %70 = arith.addf %65, %69 : vector<64x128xf32>
    %c56_i32_28 = arith.constant 56 : i32
    %71 = vector.broadcast %c56_i32_28 : i32 to vector<64x32xi32>
    %72 = arith.cmpi slt, %17, %71 : vector<64x32xi32>
    %73 = vector.extract_strided_slice %14 {offsets = [8, 0], sizes = [56, 32], strides = [1, 1]} : vector<64x32xf32> to vector<56x32xf32>
    %74 = vector.extract_strided_slice %14 {offsets = [0, 0], sizes = [8, 32], strides = [1, 1]} : vector<64x32xf32> to vector<8x32xf32>
    %75 = tpu.concatenate %73, %74 in 0 : vector<56x32xf32>, vector<8x32xf32> -> vector<64x32xf32>
    %cst_29 = arith.constant 0.000000e+00 : f32
    %76 = vector.broadcast %cst_29 : f32 to vector<64x32xf32>
    %77 = arith.select %72, %75, %76 : vector<64x32xi1>, vector<64x32xf32>
    %78 = arith.truncf %77 : vector<64x32xf32> to vector<64x32xbf16>
    %c7 = arith.constant 7 : index
    %c0_30 = arith.constant 0 : index
    %c0_31 = arith.constant 0 : index
    %79 = vector.load %arg7[%c7, %c0_30, %c0_31] : memref<9x32x128xbf16, #tpu.memory_space<vmem>>, vector<1x32x128xbf16>
    %80 = vector.shape_cast %79 : vector<1x32x128xbf16> to vector<32x128xbf16>
    %cst_32 = arith.constant dense<0.000000e+00> : vector<64x128xf32>
    %81 = tpu.matmul %78, %80, %cst_32 {dimension_numbers = #tpu.dot_dimension_numbers<[1], [0], [0], [1], [0, 0, 1, 1], [], []>} : vector<64x32xbf16>, vector<32x128xbf16>, vector<64x128xf32> -> vector<64x128xf32>
    %82 = arith.addf %70, %81 : vector<64x128xf32>
    %c6_i32 = arith.constant 6 : i32
    %83 = vector.broadcast %c6_i32 : i32 to vector<64x32xi32>
    %84 = arith.cmpi sle, %16, %83 : vector<64x32xi32>
    %85 = vector.extract_strided_slice %14 {offsets = [1, 0], sizes = [63, 32], strides = [1, 1]} : vector<64x32xf32> to vector<63x32xf32>
    %86 = vector.extract_strided_slice %14 {offsets = [0, 0], sizes = [1, 32], strides = [1, 1]} : vector<64x32xf32> to vector<1x32xf32>
    %87 = tpu.concatenate %85, %86 in 0 : vector<63x32xf32>, vector<1x32xf32> -> vector<64x32xf32>
    %cst_33 = arith.constant 0.000000e+00 : f32
    %88 = vector.broadcast %cst_33 : f32 to vector<64x32xf32>
    %89 = arith.select %84, %87, %88 : vector<64x32xi1>, vector<64x32xf32>
    %c8_i32_34 = arith.constant 8 : i32
    %90 = vector.broadcast %c8_i32_34 : i32 to vector<64x32xi32>
    %91 = arith.cmpi sge, %17, %90 : vector<64x32xi32>
    %92 = vector.extract_strided_slice %89 {offsets = [56, 0], sizes = [8, 32], strides = [1, 1]} : vector<64x32xf32> to vector<8x32xf32>
    %93 = vector.extract_strided_slice %89 {offsets = [0, 0], sizes = [56, 32], strides = [1, 1]} : vector<64x32xf32> to vector<56x32xf32>
    %94 = tpu.concatenate %92, %93 in 0 : vector<8x32xf32>, vector<56x32xf32> -> vector<64x32xf32>
    %cst_35 = arith.constant 0.000000e+00 : f32
    %95 = vector.broadcast %cst_35 : f32 to vector<64x32xf32>
    %96 = arith.select %91, %94, %95 : vector<64x32xi1>, vector<64x32xf32>
    %97 = arith.truncf %96 : vector<64x32xf32> to vector<64x32xbf16>
    %c2 = arith.constant 2 : index
    %c0_36 = arith.constant 0 : index
    %c0_37 = arith.constant 0 : index
    %98 = vector.load %arg7[%c2, %c0_36, %c0_37] : memref<9x32x128xbf16, #tpu.memory_space<vmem>>, vector<1x32x128xbf16>
    %99 = vector.shape_cast %98 : vector<1x32x128xbf16> to vector<32x128xbf16>
    %cst_38 = arith.constant dense<0.000000e+00> : vector<64x128xf32>
    %100 = tpu.matmul %97, %99, %cst_38 {dimension_numbers = #tpu.dot_dimension_numbers<[1], [0], [0], [1], [0, 0, 1, 1], [], []>} : vector<64x32xbf16>, vector<32x128xbf16>, vector<64x128xf32> -> vector<64x128xf32>
    %101 = arith.addf %82, %100 : vector<64x128xf32>
    %102 = arith.truncf %89 : vector<64x32xf32> to vector<64x32xbf16>
    %c5 = arith.constant 5 : index
    %c0_39 = arith.constant 0 : index
    %c0_40 = arith.constant 0 : index
    %103 = vector.load %arg7[%c5, %c0_39, %c0_40] : memref<9x32x128xbf16, #tpu.memory_space<vmem>>, vector<1x32x128xbf16>
    %104 = vector.shape_cast %103 : vector<1x32x128xbf16> to vector<32x128xbf16>
    %cst_41 = arith.constant dense<0.000000e+00> : vector<64x128xf32>
    %105 = tpu.matmul %102, %104, %cst_41 {dimension_numbers = #tpu.dot_dimension_numbers<[1], [0], [0], [1], [0, 0, 1, 1], [], []>} : vector<64x32xbf16>, vector<32x128xbf16>, vector<64x128xf32> -> vector<64x128xf32>
    %106 = arith.addf %101, %105 : vector<64x128xf32>
    %c56_i32_42 = arith.constant 56 : i32
    %107 = vector.broadcast %c56_i32_42 : i32 to vector<64x32xi32>
    %108 = arith.cmpi slt, %17, %107 : vector<64x32xi32>
    %109 = vector.extract_strided_slice %89 {offsets = [8, 0], sizes = [56, 32], strides = [1, 1]} : vector<64x32xf32> to vector<56x32xf32>
    %110 = vector.extract_strided_slice %89 {offsets = [0, 0], sizes = [8, 32], strides = [1, 1]} : vector<64x32xf32> to vector<8x32xf32>
    %111 = tpu.concatenate %109, %110 in 0 : vector<56x32xf32>, vector<8x32xf32> -> vector<64x32xf32>
    %cst_43 = arith.constant 0.000000e+00 : f32
    %112 = vector.broadcast %cst_43 : f32 to vector<64x32xf32>
    %113 = arith.select %108, %111, %112 : vector<64x32xi1>, vector<64x32xf32>
    %114 = arith.truncf %113 : vector<64x32xf32> to vector<64x32xbf16>
    %c8 = arith.constant 8 : index
    %c0_44 = arith.constant 0 : index
    %c0_45 = arith.constant 0 : index
    %115 = vector.load %arg7[%c8, %c0_44, %c0_45] : memref<9x32x128xbf16, #tpu.memory_space<vmem>>, vector<1x32x128xbf16>
    %116 = vector.shape_cast %115 : vector<1x32x128xbf16> to vector<32x128xbf16>
    %cst_46 = arith.constant dense<0.000000e+00> : vector<64x128xf32>
    %117 = tpu.matmul %114, %116, %cst_46 {dimension_numbers = #tpu.dot_dimension_numbers<[1], [0], [0], [1], [0, 0, 1, 1], [], []>} : vector<64x32xbf16>, vector<32x128xbf16>, vector<64x128xf32> -> vector<64x128xf32>
    %118 = arith.addf %106, %117 : vector<64x128xf32>
    %c0_47 = arith.constant 0 : index
    %c0_48 = arith.constant 0 : index
    %c0_49 = arith.constant 0 : index
    %119 = vector.load %arg2[%c0_47, %c0_48, %c0_49] : memref<1x64x128xf32, #tpu.memory_space<vmem>>, vector<1x64x128xf32>
    %120 = vector.shape_cast %119 : vector<1x64x128xf32> to vector<64x128xf32>
    %c0_50 = arith.constant 0 : index
    %c0_51 = arith.constant 0 : index
    %121 = vector.load %arg4[%c0_50, %c0_51] : memref<1x128xf32, #tpu.memory_space<vmem>>, vector<1x128xf32>
    %122 = vector.shape_cast %121 : vector<1x128xf32> to vector<128xf32>
    %c0_52 = arith.constant 0 : index
    %c0_53 = arith.constant 0 : index
    %123 = vector.load %arg6[%c0_52, %c0_53] : memref<1x128xf32, #tpu.memory_space<vmem>>, vector<1x128xf32>
    %124 = vector.shape_cast %123 : vector<1x128xf32> to vector<128xf32>
    %125 = vector.shape_cast %122 : vector<128xf32> to vector<1x128xf32>
    %126 = vector.broadcast %125 : vector<1x128xf32> to vector<64x128xf32>
    %127 = arith.mulf %120, %126 : vector<64x128xf32>
    %128 = vector.shape_cast %124 : vector<128xf32> to vector<1x128xf32>
    %129 = vector.broadcast %128 : vector<1x128xf32> to vector<64x128xf32>
    %130 = arith.addf %127, %129 : vector<64x128xf32>
    %cst_54 = arith.constant 0.000000e+00 : f32
    %131 = vector.broadcast %cst_54 : f32 to vector<64x128xf32>
    %132 = arith.maximumf %130, %131 : vector<64x128xf32>
    %133 = tpu.iota {dimensions = array<i32: 1>} : vector<8x8x128xi32>
    %134 = vector.shape_cast %133 : vector<8x8x128xi32> to vector<64x128xi32>
    %135 = tpu.iota {dimensions = array<i32: 0>} : vector<64x128xi32>
    %c1_i32_55 = arith.constant 1 : i32
    %136 = vector.broadcast %c1_i32_55 : i32 to vector<64x128xi32>
    %137 = arith.cmpi sge, %134, %136 : vector<64x128xi32>
    %138 = vector.extract_strided_slice %132 {offsets = [63, 0], sizes = [1, 128], strides = [1, 1]} : vector<64x128xf32> to vector<1x128xf32>
    %139 = vector.extract_strided_slice %132 {offsets = [0, 0], sizes = [63, 128], strides = [1, 1]} : vector<64x128xf32> to vector<63x128xf32>
    %140 = tpu.concatenate %138, %139 in 0 : vector<1x128xf32>, vector<63x128xf32> -> vector<64x128xf32>
    %cst_56 = arith.constant 0.000000e+00 : f32
    %141 = vector.broadcast %cst_56 : f32 to vector<64x128xf32>
    %142 = arith.select %137, %140, %141 : vector<64x128xi1>, vector<64x128xf32>
    %c8_i32_57 = arith.constant 8 : i32
    %143 = vector.broadcast %c8_i32_57 : i32 to vector<64x128xi32>
    %144 = arith.cmpi sge, %135, %143 : vector<64x128xi32>
    %145 = vector.extract_strided_slice %142 {offsets = [56, 0], sizes = [8, 128], strides = [1, 1]} : vector<64x128xf32> to vector<8x128xf32>
    %146 = vector.extract_strided_slice %142 {offsets = [0, 0], sizes = [56, 128], strides = [1, 1]} : vector<64x128xf32> to vector<56x128xf32>
    %147 = tpu.concatenate %145, %146 in 0 : vector<8x128xf32>, vector<56x128xf32> -> vector<64x128xf32>
    %cst_58 = arith.constant 0.000000e+00 : f32
    %148 = vector.broadcast %cst_58 : f32 to vector<64x128xf32>
    %149 = arith.select %144, %147, %148 : vector<64x128xi1>, vector<64x128xf32>
    %150 = arith.truncf %149 : vector<64x128xf32> to vector<64x128xbf16>
    %c0_59 = arith.constant 0 : index
    %c0_60 = arith.constant 0 : index
    %c0_61 = arith.constant 0 : index
    %151 = vector.load %arg8[%c0_59, %c0_60, %c0_61] : memref<9x128x128xbf16, #tpu.memory_space<vmem>>, vector<1x128x128xbf16>
    %152 = vector.shape_cast %151 : vector<1x128x128xbf16> to vector<128x128xbf16>
    %cst_62 = arith.constant dense<0.000000e+00> : vector<64x128xf32>
    %153 = tpu.matmul %150, %152, %cst_62 {dimension_numbers = #tpu.dot_dimension_numbers<[1], [0], [0], [1], [0, 0, 1, 1], [], []>} : vector<64x128xbf16>, vector<128x128xbf16>, vector<64x128xf32> -> vector<64x128xf32>
    %154 = arith.addf %118, %153 : vector<64x128xf32>
    %155 = arith.truncf %142 : vector<64x128xf32> to vector<64x128xbf16>
    %c3_63 = arith.constant 3 : index
    %c0_64 = arith.constant 0 : index
    %c0_65 = arith.constant 0 : index
    %156 = vector.load %arg8[%c3_63, %c0_64, %c0_65] : memref<9x128x128xbf16, #tpu.memory_space<vmem>>, vector<1x128x128xbf16>
    %157 = vector.shape_cast %156 : vector<1x128x128xbf16> to vector<128x128xbf16>
    %cst_66 = arith.constant dense<0.000000e+00> : vector<64x128xf32>
    %158 = tpu.matmul %155, %157, %cst_66 {dimension_numbers = #tpu.dot_dimension_numbers<[1], [0], [0], [1], [0, 0, 1, 1], [], []>} : vector<64x128xbf16>, vector<128x128xbf16>, vector<64x128xf32> -> vector<64x128xf32>
    %159 = arith.addf %154, %158 : vector<64x128xf32>
    %c56_i32_67 = arith.constant 56 : i32
    %160 = vector.broadcast %c56_i32_67 : i32 to vector<64x128xi32>
    %161 = arith.cmpi slt, %135, %160 : vector<64x128xi32>
    %162 = vector.extract_strided_slice %142 {offsets = [8, 0], sizes = [56, 128], strides = [1, 1]} : vector<64x128xf32> to vector<56x128xf32>
    %163 = vector.extract_strided_slice %142 {offsets = [0, 0], sizes = [8, 128], strides = [1, 1]} : vector<64x128xf32> to vector<8x128xf32>
    %164 = tpu.concatenate %162, %163 in 0 : vector<56x128xf32>, vector<8x128xf32> -> vector<64x128xf32>
    %cst_68 = arith.constant 0.000000e+00 : f32
    %165 = vector.broadcast %cst_68 : f32 to vector<64x128xf32>
    %166 = arith.select %161, %164, %165 : vector<64x128xi1>, vector<64x128xf32>
    %167 = arith.truncf %166 : vector<64x128xf32> to vector<64x128xbf16>
    %c6_69 = arith.constant 6 : index
    %c0_70 = arith.constant 0 : index
    %c0_71 = arith.constant 0 : index
    %168 = vector.load %arg8[%c6_69, %c0_70, %c0_71] : memref<9x128x128xbf16, #tpu.memory_space<vmem>>, vector<1x128x128xbf16>
    %169 = vector.shape_cast %168 : vector<1x128x128xbf16> to vector<128x128xbf16>
    %cst_72 = arith.constant dense<0.000000e+00> : vector<64x128xf32>
    %170 = tpu.matmul %167, %169, %cst_72 {dimension_numbers = #tpu.dot_dimension_numbers<[1], [0], [0], [1], [0, 0, 1, 1], [], []>} : vector<64x128xbf16>, vector<128x128xbf16>, vector<64x128xf32> -> vector<64x128xf32>
    %171 = arith.addf %159, %170 : vector<64x128xf32>
    %c8_i32_73 = arith.constant 8 : i32
    %172 = vector.broadcast %c8_i32_73 : i32 to vector<64x128xi32>
    %173 = arith.cmpi sge, %135, %172 : vector<64x128xi32>
    %174 = vector.extract_strided_slice %132 {offsets = [56, 0], sizes = [8, 128], strides = [1, 1]} : vector<64x128xf32> to vector<8x128xf32>
    %175 = vector.extract_strided_slice %132 {offsets = [0, 0], sizes = [56, 128], strides = [1, 1]} : vector<64x128xf32> to vector<56x128xf32>
    %176 = tpu.concatenate %174, %175 in 0 : vector<8x128xf32>, vector<56x128xf32> -> vector<64x128xf32>
    %cst_74 = arith.constant 0.000000e+00 : f32
    %177 = vector.broadcast %cst_74 : f32 to vector<64x128xf32>
    %178 = arith.select %173, %176, %177 : vector<64x128xi1>, vector<64x128xf32>
    %179 = arith.truncf %178 : vector<64x128xf32> to vector<64x128xbf16>
    %c1_75 = arith.constant 1 : index
    %c0_76 = arith.constant 0 : index
    %c0_77 = arith.constant 0 : index
    %180 = vector.load %arg8[%c1_75, %c0_76, %c0_77] : memref<9x128x128xbf16, #tpu.memory_space<vmem>>, vector<1x128x128xbf16>
    %181 = vector.shape_cast %180 : vector<1x128x128xbf16> to vector<128x128xbf16>
    %cst_78 = arith.constant dense<0.000000e+00> : vector<64x128xf32>
    %182 = tpu.matmul %179, %181, %cst_78 {dimension_numbers = #tpu.dot_dimension_numbers<[1], [0], [0], [1], [0, 0, 1, 1], [], []>} : vector<64x128xbf16>, vector<128x128xbf16>, vector<64x128xf32> -> vector<64x128xf32>
    %183 = arith.addf %171, %182 : vector<64x128xf32>
    %184 = arith.truncf %132 : vector<64x128xf32> to vector<64x128xbf16>
    %c4_79 = arith.constant 4 : index
    %c0_80 = arith.constant 0 : index
    %c0_81 = arith.constant 0 : index
    %185 = vector.load %arg8[%c4_79, %c0_80, %c0_81] : memref<9x128x128xbf16, #tpu.memory_space<vmem>>, vector<1x128x128xbf16>
    %186 = vector.shape_cast %185 : vector<1x128x128xbf16> to vector<128x128xbf16>
    %cst_82 = arith.constant dense<0.000000e+00> : vector<64x128xf32>
    %187 = tpu.matmul %184, %186, %cst_82 {dimension_numbers = #tpu.dot_dimension_numbers<[1], [0], [0], [1], [0, 0, 1, 1], [], []>} : vector<64x128xbf16>, vector<128x128xbf16>, vector<64x128xf32> -> vector<64x128xf32>
    %188 = arith.addf %183, %187 : vector<64x128xf32>
    %c56_i32_83 = arith.constant 56 : i32
    %189 = vector.broadcast %c56_i32_83 : i32 to vector<64x128xi32>
    %190 = arith.cmpi slt, %135, %189 : vector<64x128xi32>
    %191 = vector.extract_strided_slice %132 {offsets = [8, 0], sizes = [56, 128], strides = [1, 1]} : vector<64x128xf32> to vector<56x128xf32>
    %192 = vector.extract_strided_slice %132 {offsets = [0, 0], sizes = [8, 128], strides = [1, 1]} : vector<64x128xf32> to vector<8x128xf32>
    %193 = tpu.concatenate %191, %192 in 0 : vector<56x128xf32>, vector<8x128xf32> -> vector<64x128xf32>
    %cst_84 = arith.constant 0.000000e+00 : f32
    %194 = vector.broadcast %cst_84 : f32 to vector<64x128xf32>
    %195 = arith.select %190, %193, %194 : vector<64x128xi1>, vector<64x128xf32>
    %196 = arith.truncf %195 : vector<64x128xf32> to vector<64x128xbf16>
    %c7_85 = arith.constant 7 : index
    %c0_86 = arith.constant 0 : index
    %c0_87 = arith.constant 0 : index
    %197 = vector.load %arg8[%c7_85, %c0_86, %c0_87] : memref<9x128x128xbf16, #tpu.memory_space<vmem>>, vector<1x128x128xbf16>
    %198 = vector.shape_cast %197 : vector<1x128x128xbf16> to vector<128x128xbf16>
    %cst_88 = arith.constant dense<0.000000e+00> : vector<64x128xf32>
    %199 = tpu.matmul %196, %198, %cst_88 {dimension_numbers = #tpu.dot_dimension_numbers<[1], [0], [0], [1], [0, 0, 1, 1], [], []>} : vector<64x128xbf16>, vector<128x128xbf16>, vector<64x128xf32> -> vector<64x128xf32>
    %200 = arith.addf %188, %199 : vector<64x128xf32>
    %c6_i32_89 = arith.constant 6 : i32
    %201 = vector.broadcast %c6_i32_89 : i32 to vector<64x128xi32>
    %202 = arith.cmpi sle, %134, %201 : vector<64x128xi32>
    %203 = vector.extract_strided_slice %132 {offsets = [1, 0], sizes = [63, 128], strides = [1, 1]} : vector<64x128xf32> to vector<63x128xf32>
    %204 = vector.extract_strided_slice %132 {offsets = [0, 0], sizes = [1, 128], strides = [1, 1]} : vector<64x128xf32> to vector<1x128xf32>
    %205 = tpu.concatenate %203, %204 in 0 : vector<63x128xf32>, vector<1x128xf32> -> vector<64x128xf32>
    %cst_90 = arith.constant 0.000000e+00 : f32
    %206 = vector.broadcast %cst_90 : f32 to vector<64x128xf32>
    %207 = arith.select %202, %205, %206 : vector<64x128xi1>, vector<64x128xf32>
    %c8_i32_91 = arith.constant 8 : i32
    %208 = vector.broadcast %c8_i32_91 : i32 to vector<64x128xi32>
    %209 = arith.cmpi sge, %135, %208 : vector<64x128xi32>
    %210 = vector.extract_strided_slice %207 {offsets = [56, 0], sizes = [8, 128], strides = [1, 1]} : vector<64x128xf32> to vector<8x128xf32>
    %211 = vector.extract_strided_slice %207 {offsets = [0, 0], sizes = [56, 128], strides = [1, 1]} : vector<64x128xf32> to vector<56x128xf32>
    %212 = tpu.concatenate %210, %211 in 0 : vector<8x128xf32>, vector<56x128xf32> -> vector<64x128xf32>
    %cst_92 = arith.constant 0.000000e+00 : f32
    %213 = vector.broadcast %cst_92 : f32 to vector<64x128xf32>
    %214 = arith.select %209, %212, %213 : vector<64x128xi1>, vector<64x128xf32>
    %215 = arith.truncf %214 : vector<64x128xf32> to vector<64x128xbf16>
    %c2_93 = arith.constant 2 : index
    %c0_94 = arith.constant 0 : index
    %c0_95 = arith.constant 0 : index
    %216 = vector.load %arg8[%c2_93, %c0_94, %c0_95] : memref<9x128x128xbf16, #tpu.memory_space<vmem>>, vector<1x128x128xbf16>
    %217 = vector.shape_cast %216 : vector<1x128x128xbf16> to vector<128x128xbf16>
    %cst_96 = arith.constant dense<0.000000e+00> : vector<64x128xf32>
    %218 = tpu.matmul %215, %217, %cst_96 {dimension_numbers = #tpu.dot_dimension_numbers<[1], [0], [0], [1], [0, 0, 1, 1], [], []>} : vector<64x128xbf16>, vector<128x128xbf16>, vector<64x128xf32> -> vector<64x128xf32>
    %219 = arith.addf %200, %218 : vector<64x128xf32>
    %220 = arith.truncf %207 : vector<64x128xf32> to vector<64x128xbf16>
    %c5_97 = arith.constant 5 : index
    %c0_98 = arith.constant 0 : index
    %c0_99 = arith.constant 0 : index
    %221 = vector.load %arg8[%c5_97, %c0_98, %c0_99] : memref<9x128x128xbf16, #tpu.memory_space<vmem>>, vector<1x128x128xbf16>
    %222 = vector.shape_cast %221 : vector<1x128x128xbf16> to vector<128x128xbf16>
    %cst_100 = arith.constant dense<0.000000e+00> : vector<64x128xf32>
    %223 = tpu.matmul %220, %222, %cst_100 {dimension_numbers = #tpu.dot_dimension_numbers<[1], [0], [0], [1], [0, 0, 1, 1], [], []>} : vector<64x128xbf16>, vector<128x128xbf16>, vector<64x128xf32> -> vector<64x128xf32>
    %224 = arith.addf %219, %223 : vector<64x128xf32>
    %c56_i32_101 = arith.constant 56 : i32
    %225 = vector.broadcast %c56_i32_101 : i32 to vector<64x128xi32>
    %226 = arith.cmpi slt, %135, %225 : vector<64x128xi32>
    %227 = vector.extract_strided_slice %207 {offsets = [8, 0], sizes = [56, 128], strides = [1, 1]} : vector<64x128xf32> to vector<56x128xf32>
    %228 = vector.extract_strided_slice %207 {offsets = [0, 0], sizes = [8, 128], strides = [1, 1]} : vector<64x128xf32> to vector<8x128xf32>
    %229 = tpu.concatenate %227, %228 in 0 : vector<56x128xf32>, vector<8x128xf32> -> vector<64x128xf32>
    %cst_102 = arith.constant 0.000000e+00 : f32
    %230 = vector.broadcast %cst_102 : f32 to vector<64x128xf32>
    %231 = arith.select %226, %229, %230 : vector<64x128xi1>, vector<64x128xf32>
    %232 = arith.truncf %231 : vector<64x128xf32> to vector<64x128xbf16>
    %c8_103 = arith.constant 8 : index
    %c0_104 = arith.constant 0 : index
    %c0_105 = arith.constant 0 : index
    %233 = vector.load %arg8[%c8_103, %c0_104, %c0_105] : memref<9x128x128xbf16, #tpu.memory_space<vmem>>, vector<1x128x128xbf16>
    %234 = vector.shape_cast %233 : vector<1x128x128xbf16> to vector<128x128xbf16>
    %cst_106 = arith.constant dense<0.000000e+00> : vector<64x128xf32>
    %235 = tpu.matmul %232, %234, %cst_106 {dimension_numbers = #tpu.dot_dimension_numbers<[1], [0], [0], [1], [0, 0, 1, 1], [], []>} : vector<64x128xbf16>, vector<128x128xbf16>, vector<64x128xf32> -> vector<64x128xf32>
    %236 = arith.addf %224, %235 : vector<64x128xf32>
    %c0_107 = arith.constant 0 : index
    %c0_108 = arith.constant 0 : index
    %c0_109 = arith.constant 0 : index
    %237 = vector.load %arg9[%c0_107, %c0_108, %c0_109] : memref<1x64x128xf32, #tpu.memory_space<vmem>>, vector<1x64x128xf32>
    %238 = vector.shape_cast %237 : vector<1x64x128xf32> to vector<64x128xf32>
    %239 = vector.shape_cast %236 : vector<64x128xf32> to vector<1x64x128xf32>
    tpu.vector_store %arg9[%c0_107, %c0_108, %c0_109], %239 {strides = array<i32>} : memref<1x64x128xf32, #tpu.memory_space<vmem>>, vector<1x64x128xf32>,
    return
  }
  func.func @transform_0(%arg0: i32) -> (i32, i32, i32) {
    %c0_i32 = arith.constant 0 : i32
    %c0_i32_0 = arith.constant 0 : i32
    %c0_i32_1 = arith.constant 0 : i32
    return %arg0, %c0_i32, %c0_i32_0 : i32, i32, i32
  }
  func.func @transform_1(%arg0: i32) -> (i32, i32, i32) {
    %c0_i32 = arith.constant 0 : i32
    %c0_i32_0 = arith.constant 0 : i32
    %c0_i32_1 = arith.constant 0 : i32
    return %arg0, %c0_i32, %c0_i32_0 : i32, i32, i32
  }
  func.func @transform_2(%arg0: i32) -> (i32, i32) {
    %c0_i32 = arith.constant 0 : i32
    %c0_i32_0 = arith.constant 0 : i32
    %c0_i32_1 = arith.constant 0 : i32
    return %c0_i32, %c0_i32_0 : i32, i32
  }
  func.func @transform_3(%arg0: i32) -> (i32, i32) {
    %c0_i32 = arith.constant 0 : i32
    %c0_i32_0 = arith.constant 0 : i32
    %c0_i32_1 = arith.constant 0 : i32
    return %c0_i32, %c0_i32_0 : i32, i32
  }
  func.func @transform_4(%arg0: i32) -> (i32, i32) {
    %c0_i32 = arith.constant 0 : i32
    %c0_i32_0 = arith.constant 0 : i32
    %c0_i32_1 = arith.constant 0 : i32
    return %c0_i32, %c0_i32_0 : i32, i32
  }
  func.func @transform_5(%arg0: i32) -> (i32, i32) {
    %c0_i32 = arith.constant 0 : i32
    %c0_i32_0 = arith.constant 0 : i32
    %c0_i32_1 = arith.constant 0 : i32
    return %c0_i32, %c0_i32_0 : i32, i32
  }
  func.func @transform_6(%arg0: i32) -> (i32, i32, i32) {
    %c0_i32 = arith.constant 0 : i32
    %c0_i32_0 = arith.constant 0 : i32
    %c0_i32_1 = arith.constant 0 : i32
    %c0_i32_2 = arith.constant 0 : i32
    return %c0_i32, %c0_i32_0, %c0_i32_1 : i32, i32, i32
  }
  func.func @transform_7(%arg0: i32) -> (i32, i32, i32) {
    %c0_i32 = arith.constant 0 : i32
    %c0_i32_0 = arith.constant 0 : i32
    %c0_i32_1 = arith.constant 0 : i32
    %c0_i32_2 = arith.constant 0 : i32
    return %c0_i32, %c0_i32_0, %c0_i32_1 : i32, i32, i32
  }
  func.func @transform_8(%arg0: i32) -> (i32, i32, i32) {
    %c0_i32 = arith.constant 0 : i32
    %c0_i32_0 = arith.constant 0 : i32
    %c0_i32_1 = arith.constant 0 : i32
    return %arg0, %c0_i32, %c0_i32_0 : i32, i32, i32
  }
}

</mosaic_0001>

<bundles_post_ra>
// kernel: tile.38
= control target key start
LH: loop header
LB: loop body
LE: loop exit
PB: predicated region body
PF: predicated region fallthrough
CT: control target
= control target key end

     0   :  { %s22_s0 = inlined_call_operand.vmem [shape: f32[4], index: 0, kind: input, shape index: {}]   ;;  %s23_s1 = inlined_call_operand.vmem [shape: f32[8,4], index: 1, kind: output, shape index: {}]  }
   0x1   :  { %v4_v0 = vld [vmem:[%s22_s0] ss:$0 sm:$0xff] }
   0x2   :  { %5 = vst [vmem:[%s23_s1] sm:$0xff] %v4_v0 }

// kernel: tile.39
= control target key start
LH: loop header
LB: loop body
LE: loop exit
PB: predicated region body
PF: predicated region fallthrough
CT: control target
= control target key end

     0   :  { %s67_s10 = smov 28   ;;  %s68_s11 = smov 20   ;;  %vm3_vm0 = vcmask 31744   ;;  %vm9_vm1 = vcmask 261344   ;;  %vm15_vm2 = vcmask 228544   ;;  %vm21_vm3 = vcmask 195744   ;;  %s111_s0 = inlined_call_operand.vmem [shape: f32[8,4], index: 0, kind: input, shape index: {}]   ;;  %s112_s1 = inlined_call_operand.vmem [shape: f32[1,32], index: 1, kind: output, shape index: {}]  }
   0x1   :  { %v53_v0 = vld [vmem:[%s111_s0 + $0x7] sm:$0x1]   ;;  %v55_v1 = vld [vmem:[%s111_s0 + $0x5] sm:$0x1]   ;;  %v54_v2 = vld [vmem:[%s111_s0 + $0x6] sm:$0x1]  }
   0x2   :  { %7 = vrot.lane.b32.xlu0 %v53_v0, %s67_s10  ;;  %19 = vrot.lane.b32.xlu1 %v55_v1, %s68_s11  ;;  %v56_v3 = vld [vmem:[%s111_s0 + $0x4] sm:$0x1]   ;;  %v2_v4 = vld [vmem:[%s111_s0] sm:$0x1]   ;;  %s69_s18 = smov 24   ;;  %s70_s19 = smov 16  }
   0x3   :  { %4 = vst.msk [vmem:[#allocation0] sm:$0x1] %vm3_vm0, %v2_v4   ;;  %v57_v5 = vld [vmem:[%s111_s0 + $0x3] sm:$0x1]   ;;  %v58_v6 = vld [vmem:[%s111_s0 + $0x2] sm:$0x1]  }
   0x4   :  { %s71_s24 = smov 12   ;;  %s72_s25 = smov 8   ;;  %v59_v7 = vld [vmem:[%s111_s0 + $0x1] sm:$0x1]   ;;  %vm27_vm4 = vcmask 162944   ;;  %vm33_vm5 = vcmask 130144  }
   0x5   :  { %s73_s0 = smov 4   ;;  %vm39_vm6 = vcmask 97344   ;;  %vm45_vm7 = vcmask 64544  }
   0x6   :  { %13 = vrot.lane.b32.xlu0 %v54_v2, %s69_s18  ;;  %25 = vrot.lane.b32.xlu1 %v56_v3, %s70_s19 }
   0xa   :  { %31 = vrot.lane.b32.xlu0 %v57_v5, %s71_s24  ;;  %37 = vrot.lane.b32.xlu1 %v58_v6, %s72_s25 }
   0xe   :  { %43 = vrot.lane.b32.xlu0 %v59_v7, %s73_s0 }
  0x74   :  { %v8_v8 = vpop.permute.xlu0 %7   ;;  %v20_v9 = vpop.permute.xlu1 %19  }
  0x75   :  { %10 = vst.msk [vmem:[#allocation0] sm:$0x1] %vm9_vm1, %v8_v8  }
  0x78   :  { %v14_v10 = vpop.permute.xlu0 %13   ;;  %v26_v11 = vpop.permute.xlu1 %25  }
  0x79   :  { %16 = vst.msk [vmem:[#allocation0] sm:$0x1] %vm15_vm2, %v14_v10  }
  0x7a   :  { %22 = vst.msk [vmem:[#allocation0] sm:$0x1] %vm21_vm3, %v20_v9  }
  0x7b   :  { %28 = vst.msk [vmem:[#allocation0] sm:$0x1] %vm27_vm4, %v26_v11  }
  0x7c   :  { %v32_v12 = vpop.permute.xlu0 %31   ;;  %v38_v13 = vpop.permute.xlu1 %37  }
  0x7d   :  { %34 = vst.msk [vmem:[#allocation0] sm:$0x1] %vm33_vm5, %v32_v12  }
  0x7e   :  { %40 = vst.msk [vmem:[#allocation0] sm:$0x1] %vm39_vm6, %v38_v13  }
  0x80   :  { %v44_v14 = vpop.permute.xlu0 %43  }
  0x81   :  { %46 = vst.msk [vmem:[#allocation0] sm:$0x1] %vm45_vm7, %v44_v14  }
  0x88   :  { %v50_v15 = vld [vmem:[#allocation0] sm:$0x1] }
  0x89   :  { %52 = vst [vmem:[%s112_s1] sm:$0x1] %v50_v15 }

// kernel: tile.59
= control target key start
LH: loop header
LB: loop body
LE: loop exit
PB: predicated region body
PF: predicated region fallthrough
CT: control target
= control target key end

     0   :  { %s67_s10 = smov 112   ;;  %s68_s11 = smov 80   ;;  %vm3_vm0 = vcmask 130048   ;;  %vm9_vm1 = vcmask 1048448   ;;  %vm15_vm2 = vcmask 917248   ;;  %vm21_vm3 = vcmask 786048   ;;  %s111_s0 = inlined_call_operand.vmem [shape: f32[8,16], index: 0, kind: input, shape index: {}]   ;;  %s112_s1 = inlined_call_operand.vmem [shape: f32[1,128], index: 1, kind: output, shape index: {}]  }
   0x1   :  { %v53_v0 = vld [vmem:[%s111_s0 + $0x7] sm:$0x1]   ;;  %v55_v1 = vld [vmem:[%s111_s0 + $0x5] sm:$0x1]   ;;  %v54_v2 = vld [vmem:[%s111_s0 + $0x6] sm:$0x1]  }
   0x2   :  { %7 = vrot.lane.b32.xlu0 %v53_v0, %s67_s10  ;;  %19 = vrot.lane.b32.xlu1 %v55_v1, %s68_s11  ;;  %v56_v3 = vld [vmem:[%s111_s0 + $0x4] sm:$0x1]   ;;  %v2_v4 = vld [vmem:[%s111_s0] sm:$0x1]   ;;  %s69_s18 = smov 96   ;;  %s70_s19 = smov 64  }
   0x3   :  { %4 = vst.msk [vmem:[#allocation0] sm:$0x1] %vm3_vm0, %v2_v4   ;;  %v57_v5 = vld [vmem:[%s111_s0 + $0x3] sm:$0x1]   ;;  %v58_v6 = vld [vmem:[%s111_s0 + $0x2] sm:$0x1]  }
   0x4   :  { %s71_s24 = smov 48   ;;  %s72_s25 = smov 32   ;;  %v59_v7 = vld [vmem:[%s111_s0 + $0x1] sm:$0x1]   ;;  %vm27_vm4 = vcmask 654848   ;;  %vm33_vm5 = vcmask 523648  }
   0x5   :  { %s73_s0 = smov 16   ;;  %vm39_vm6 = vcmask 392448   ;;  %vm45_vm7 = vcmask 261248  }
   0x6   :  { %13 = vrot.lane.b32.xlu0 %v54_v2, %s69_s18  ;;  %25 = vrot.lane.b32.xlu1 %v56_v3, %s70_s19 }
   0xa   :  { %31 = vrot.lane.b32.xlu0 %v57_v5, %s71_s24  ;;  %37 = vrot.lane.b32.xlu1 %v58_v6, %s72_s25 }
   0xe   :  { %43 = vrot.lane.b32.xlu0 %v59_v7, %s73_s0 }
  0x74   :  { %v8_v8 = vpop.permute.xlu0 %7   ;;  %v20_v9 = vpop.permute.xlu1 %19  }
  0x75   :  { %10 = vst.msk [vmem:[#allocation0] sm:$0x1] %vm9_vm1, %v8_v8  }
  0x78   :  { %v14_v10 = vpop.permute.xlu0 %13   ;;  %v26_v11 = vpop.permute.xlu1 %25  }
  0x79   :  { %16 = vst.msk [vmem:[#allocation0] sm:$0x1] %vm15_vm2, %v14_v10  }
  0x7a   :  { %22 = vst.msk [vmem:[#allocation0] sm:$0x1] %vm21_vm3, %v20_v9  }
  0x7b   :  { %28 = vst.msk [vmem:[#allocation0] sm:$0x1] %vm27_vm4, %v26_v11  }
  0x7c   :  { %v32_v12 = vpop.permute.xlu0 %31   ;;  %v38_v13 = vpop.permute.xlu1 %37  }
  0x7d   :  { %34 = vst.msk [vmem:[#allocation0] sm:$0x1] %vm33_vm5, %v32_v12  }
  0x7e   :  { %40 = vst.msk [vmem:[#allocation0] sm:$0x1] %vm39_vm6, %v38_v13  }
  0x80   :  { %v44_v14 = vpop.permute.xlu0 %43  }
  0x81   :  { %46 = vst.msk [vmem:[#allocation0] sm:$0x1] %vm45_vm7, %v44_v14  }
  0x88   :  { %v50_v15 = vld [vmem:[#allocation0] sm:$0x1] }
  0x89   :  { %52 = vst [vmem:[%s112_s1] sm:$0x1] %v50_v15 }

// kernel: dense_block.2
= control target key start
LH: loop header
LB: loop body
LE: loop exit
PB: predicated region body
PF: predicated region fallthrough
CT: control target
= control target key end

     0   :  { %s1789_s15 = smov 0   ;;  %s2100_s0 = inlined_call_operand.vmem [shape: f32[2,64,32], index: 0, kind: input, shape index: {}]   ;;  %s2101_s1 = inlined_call_operand.vmem [shape: f32[1,32], index: 1, kind: input, shape index: {}]   ;;  %s2102_s2 = inlined_call_operand.vmem [shape: f32[1,32], index: 2, kind: input, shape index: {}]   ;;  %s2103_s3 = inlined_call_operand.vmem [shape: bf16[9,32,128], index: 3, kind: input, shape index: {}]   ;;  %s2104_s4 = inlined_call_operand.vmem [shape: f32[2,64,128], index: 4, kind: output, shape index: {}]  }
   0x1 LB: > { %s1397_s16 = sadd.s32 4294967295, %s1761_s15   ;;  %p1401_p0 = scmp.ge.s32.totalorder %s1761_s15, 1  ;;  %s1761_s15 = sphi %s1789_s15, %s14_s15  }
   0x2   : > { %p162_p1 = scmp.lt.s32.totalorder %s1761_s15, 3 }
   0x4   : > { %p163_p2 = pnand %p1401_p0, %p162_p1 }
   0x5   : > { %v1800_v0 = vld [vmem:[%s2103_s3 + $0x40] sm:$0xff] (!%p163_p2)   ;;  %p188_p3 = scmp.lt.s32.totalorder (!%p163_p2), %s1397_s16, 1  ;;  %v1738_v1 = vld [vmem:[%s2103_s3 + $0x30] sm:$0xff] (!%p163_p2)   ;;  %v1809_v2 = vld [vmem:[%s2103_s3 + $0x48] sm:$0xff] (!%p163_p2)   ;;  %v245_v5 = vlaneseq (!%p163_p2)  ;;  %vm342_vm0 = vcmask (!%p163_p2), 261120   ;;  %vm265_vm1 = vcmask (!%p163_p2), 1040384  }
   0x6   : > { %166 = sbr.rel (%p163_p2) target bundleno = 319 (0x13f), region = 36  ;;  %1600 = vmatprep.subr.bf16.mxu0 (!%p163_p2), %v1800_v0  ;;  %1552 = vmatprep.subr.bf16.mxu1 (!%p163_p2), %v1738_v1  ;;  %v1740_v3 = vld [vmem:[%s2103_s3 + $0x38] sm:$0xff] (!%p163_p2)   ;;  %v1822_v4 = vld [vmem:[%s2101_s1] ss:$0 sm:$0xff] (!%p163_p2)  ;;  %v1742_v19 = vld [vmem:[%s2103_s3 + $0x70] sm:$0xff] (!%p163_p2)   ;;  %vm966_vm3 = vcmask (!%p163_p2), 1046528  }
   0x7   : > { %1601 = vmatpush3.bf16.msra.mxu0 (!%p163_p2), %v1800_v0  ;;  %1553 = vmatpush3.bf16.msra.mxu1 (!%p163_p2), %v1738_v1  ;;  %v1834_v6 = vld [vmem:[%s2102_s2] ss:$0 sm:$0xff] (!%p163_p2)  ;;  %v1852_v18 = vshrl.u32 (!%p163_p2), %v245_v5, 7  ;;  %v1743_v41 = vld [vmem:[%s2103_s3 + $0x78] sm:$0xff] (!%p163_p2)   ;;  %v1744_v57 = vld [vmem:[%s2103_s3 + $0x8] sm:$0xff] (!%p163_p2)  }
   0x8   : > { %1602 = vmatprep.subr.bf16.mxu0 (!%p163_p2), %v1809_v2  ;;  %1554 = vmatprep.subr.bf16.mxu1 (!%p163_p2), %v1740_v3  ;;  %v1839_v7 = vld [vmem:[%s2103_s3] sm:$0xff] (!%p163_p2)  }
   0x9   : > { %vm254_vm2 = vcmp.ge.s32.totalorder (!%p163_p2), %v1852_v18, 1  ;;  %v1745_v61 = vld [vmem:[%s2103_s3 + $0x20] sm:$0xff] (!%p163_p2)   ;;  %vm965_vm4 = vcmp.le.s32.totalorder (!%p163_p2), %v1852_v18, 6 }
   0xa   : > { %v1746_v5 = vld [vmem:[%s2103_s3 + $0x60] sm:$0xff] (!%p163_p2)  }
   0xb   : > { %1603 = vmatpush3.bf16.msra.mxu0 (!%p163_p2), %v1809_v2  ;;  %1555 = vmatpush3.bf16.msra.mxu1 (!%p163_p2), %v1740_v3 }
   0xc   : > { %1564 = vmatprep.subr.bf16.mxu1 (!%p163_p2), %v1839_v7  ;;  %1612 = vmatprep.subr.bf16.mxu0 (!%p163_p2), %v1742_v19 }
   0xd   : > { %s2106_s16 = smov (!%p188_p3, %s1397_s16), 1 }
   0xe   : > { %s1496_s25 = sshll.u32 %s2106_s16, 6 }
   0xf   : > { %s1829_s30 = scalar_lea.vmem %s2100_s0, %s1496_s25  ;;  %s197_s14 = scalar_lea.vmem %s2104_s4, %s1496_s25 }
  0x10   : > { %v199_v8 = vld [vmem:[%s1829_s30] sm:$0xff]  ;;  %v200_v9 = vld [vmem:[%s1829_s30 + $0x8] sm:$0xff]  ;;  %v201_v10 = vld [vmem:[%s1829_s30 + $0x10] sm:$0xff] }
  0x11   : > { %v215_v11 = vmul.f32 %v1822_v4, %v199_v8  ;;  %v216_v12 = vmul.f32 %v1822_v4, %v200_v9  ;;  %v202_v13 = vld [vmem:[%s1829_s30 + $0x18] sm:$0xff]  ;;  %v217_v14 = vmul.f32 %v1822_v4, %v201_v10  ;;  %v203_v25 = vld [vmem:[%s1829_s30 + $0x20] sm:$0xff]  ;;  %v204_v26 = vld [vmem:[%s1829_s30 + $0x28] sm:$0xff] }
  0x12   : > { %v206_v15 = vld [vmem:[%s1829_s30 + $0x38] sm:$0xff]  ;;  %v218_v16 = vmul.f32 %v1822_v4, %v202_v13  ;;  %v219_v30 = vmul.f32 %v1822_v4, %v203_v25  ;;  %v220_v33 = vmul.f32 %v1822_v4, %v204_v26  ;;  %v205_v42 = vld [vmem:[%s1829_s30 + $0x30] sm:$0xff] }
  0x13   : > { %v222_v17 = vmul.f32 %v1822_v4, %v206_v15  ;;  %v229_v20 = vadd.f32 %v1834_v6, %v215_v11  ;;  %v230_v21 = vadd.f32 %v1834_v6, %v216_v12  ;;  %v231_v22 = vadd.f32 %v1834_v6, %v217_v14  ;;  %v1747_v14 = vld [vmem:[%s2103_s3 + $0x28] sm:$0xff]  }
  0x14   : > { %v232_v23 = vadd.f32 %v1834_v6, %v218_v16  ;;  %v233_v45 = vadd.f32 %v1834_v6, %v219_v30  ;;  %v234_v46 = vadd.f32 %v1834_v6, %v220_v33  ;;  %v221_v60 = vmul.f32 %v1822_v4, %v205_v42 }
  0x15   : > { %v236_v24 = vadd.f32 %v1834_v6, %v222_v17  ;;  %v1865_v27 = vmax.f32 %v229_v20, 0.0  ;;  %v1867_v28 = vmax.f32 %v230_v21, 0.0  ;;  %v1869_v29 = vmax.f32 %v231_v22, 0.0 }
  0x16   : > { %v1872_v31 = vmax.f32 %v232_v23, 0.0  ;;  %v1913_v53 = vmax.f32 %v233_v45, 0.0  ;;  %v1918_v56 = vmax.f32 %v234_v46, 0.0  ;;  %v235_v1 = vadd.f32 %v1834_v6, %v221_v60  ;;  %v1753_v60 = vld [vmem:[%s2103_s3 + $0x80] sm:$0xff]  }
  0x17   : > { %v1874_v32 = vmax.f32 %v236_v24, 0.0  ;;  %v745_v34 = vpack.c.bf16 %v1867_v28, %v1865_v27  ;;  %v266_v35 = vrot.slane %v1865_v27, 7  ;;  %v267_v36 = vrot.slane %v1867_v28, 7 }
  0x18   : > { %v269_v37 = vrot.slane %v1869_v29, 7  ;;  %v746_v38 = vpack.c.bf16 %v1872_v31, %v1869_v29  ;;  %v271_v40 = vrot.slane %v1872_v31, 7  ;;  %v273_v58 = vrot.slane %v1913_v53, 7 }
  0x19   : > { %v256_v39 = vrot.slane %v1874_v32, 7  ;;  %1604 = vmatprep.mubr.msk.bf16.mxu0 %vm342_vm0, %v745_v34  ;;  %v268_v43 = vsel %vm265_vm1, %v266_v35, %v267_v36  ;;  %v1926_v59 = vpack.c.bf16 %v1869_v29, %v1867_v28  ;;  %v275_v62 = vrot.slane %v1918_v56, 7 }
  0x1a   : > { %v270_v44 = vsel %vm265_vm1, %v267_v36, %v269_v37  ;;  %1605 = vmatmul.mubr.msk.bf16.vlgmr.msra.gmra.mrb[0].mxu0 %vm342_vm0, %v746_v38  ;;  %v272_v47 = vsel %vm265_vm1, %v269_v37, %v271_v40  ;;  %v1901_v49 = vsel %vm254_vm2, %v268_v43, 0.0  ;;  %v274_v63 = vsel %vm265_vm1, %v271_v40, %v273_v58 }
  0x1b   : > { %v288_v48 = vsel %vm265_vm1, %v256_v39, %v266_v35  ;;  %v1905_v50 = vsel %vm254_vm2, %v270_v44, 0.0  ;;  %v1911_v52 = vsel %vm254_vm2, %v272_v47, 0.0  ;;  %1613 = vmatpush3.bf16.msra.mxu0 %v1742_v19  ;;  %v276_v3 = vsel %vm265_vm1, %v273_v58, %v275_v62  ;;  %1616 = vmatprep.mubr.msk.bf16.mxu0 %vm342_vm0, %v1926_v59 }
  0x1c   : > { %v289_v51 = vsel %vm254_vm2, %v288_v48, 0.0  ;;  %v322_v55 = vpack.c.bf16 %v1911_v52, %v1905_v50  ;;  %1614 = vmatprep.subr.bf16.mxu0 %v1743_v41  ;;  %v293_v4 = vsel %vm254_vm2, %v274_v63, 0.0  ;;  %v967_v8 = vrot.slane %v1865_v27, 1  ;;  %v1752_v63 = vld [vmem:[%s2103_s3 + $0x18] sm:$0xff]  }
  0x1d   : > { %v321_v54 = vpack.c.bf16 %v1901_v49, %v289_v51  ;;  %v968_v9 = vrot.slane %v1867_v28, 1  ;;  %v1950_v6 = vsel %vm254_vm2, %v276_v3, 0.0  ;;  %v1957_v11 = vpack.c.bf16 %v1913_v53, %v1872_v31  ;;  %v1749_v28 = vld [vmem:[%s2103_s3 + $0x50] sm:$0xff]  }
  0x1e   : > { %v323_v10 = vpack.c.bf16 %v1950_v6, %v293_v4  ;;  %v1763_v19 = vmov 0.0   ;;  %v972_v24 = vrot.slane %v1872_v31, 1  ;;  %v970_v25 = vrot.slane %v1869_v29, 1 }
  0x1f   : > { %1556 = vmatprep.mubr.msk.bf16.mxu1 %vm342_vm0, %v321_v54  ;;  %1615 = vmatpush3.bf16.msra.mxu0 %v1743_v41  ;;  %v969_v17 = vsel %vm966_vm3, %v967_v8, %v968_v9  ;;  %v313_v20 = vpack.c.bf16 %v289_v51, %v1763_v19  ;;  %v862_v30 = vpack.c.bf16 %v1763_v19, %v1874_v32  ;;  %v974_v33 = vrot.slane %v1913_v53, 1  ;;  %v1748_v41 = vld [vmem:[%s2103_s3 + $0x68] sm:$0xff]   ;;  %v1751_v54 = vld [vmem:[%s2103_s3 + $0x58] sm:$0xff]  }
  0x20   : > { %1557 = vmatmul.mubr.msk.bf16.vlgmr.msra.gmra.mrb[0].mxu1 %vm342_vm0, %v322_v55  ;;  %1624 = vmatprep.subr.bf16.mxu0 %v1745_v61  ;;  %v992_v26 = vsel %vm965_vm4, %v969_v17, 0.0  ;;  %v976_v31 = vrot.slane %v1918_v56, 1  ;;  %v971_v35 = vsel %vm966_vm3, %v968_v9, %v970_v25  ;;  %v973_v36 = vsel %vm966_vm3, %v970_v25, %v972_v24 }
  0x21   : > { %1565 = vmatpush3.bf16.msra.mxu1 %v1839_v7  ;;  %v1952_v7 = vmax.f32 %v235_v1, 0.0  ;;  %1560 = vmatprep.mubr.msk.bf16.mxu1 %vm342_vm0, %v323_v10  ;;  %v1008_v34 = vpack.c.bf16 %v992_v26, %v1763_v19  ;;  %v314_v37 = vpack.c.bf16 %v1905_v50, %v1901_v49  ;;  %v315_v38 = vpack.c.bf16 %v293_v4, %v1911_v52  ;;  %v1750_v49 = vld [vmem:[%s2103_s3 + $0x10] sm:$0xff]  }
  0x22   : > { %1566 = vmatprep.subr.bf16.mxu1 %v1744_v57  ;;  %v977_v40 = vsel %vm966_vm3, %v974_v33, %v976_v31  ;;  %v993_v42 = vsel %vm965_vm4, %v971_v35, 0.0  ;;  %v994_v43 = vsel %vm965_vm4, %v973_v36, 0.0  ;;  %v980_v45 = vrot.slane %v1874_v32, 1 }
  0x23   : > { %v277_v12 = vrot.slane %v1952_v7, 7  ;;  %v1962_v13 = vpack.c.bf16 %v1952_v7, %v1918_v56  ;;  %v748_v29 = vpack.c.bf16 %v1874_v32, %v1952_v7  ;;  %v978_v44 = vrot.slane %v1952_v7, 1 }
  0x24   : > { %v996_v47 = vsel %vm965_vm4, %v977_v40, 0.0  ;;  %v1009_v48 = vpack.c.bf16 %v994_v43, %v993_v42  ;;  %v991_v4 = vsel %vm966_vm3, %v980_v45, %v967_v8  ;;  %v747_v18 = vpack.c.bf16 %v1918_v56, %v1913_v53 }
  0x25   : > { %1567 = vmatpush3.bf16.msra.mxu1 %v1744_v57  ;;  %v278_v15 = vsel %vm265_vm1, %v275_v62, %v277_v12  ;;  %v279_v16 = vsel %vm265_vm1, %v277_v12, %v256_v39  ;;  %v975_v39 = vsel %vm966_vm3, %v972_v24, %v974_v33  ;;  %v979_v51 = vsel %vm966_vm3, %v976_v31, %v978_v44 }
  0x26   : > { %1576 = vmatprep.subr.bf16.mxu1 %v1746_v5  ;;  %v295_v21 = vsel %vm254_vm2, %v278_v15, 0.0  ;;  %v1979_v22 = vsel %vm254_vm2, %v279_v16, 0.0  ;;  %1617 = vmatmul.mubr.msk.bf16.vlgmr.msra.gmra.mrb[0].mxu0 %vm342_vm0, %v1957_v11  ;;  %v995_v46 = vsel %vm965_vm4, %v975_v39, 0.0  ;;  %v981_v52 = vsel %vm966_vm3, %v978_v44, %v980_v45 }
  0x27   : > { %v324_v23 = vpack.c.bf16 %v1979_v22, %v295_v21  ;;  %1625 = vmatpush3.bf16.msra.mxu0 %v1745_v61  ;;  %1620 = vmatprep.mubr.msk.bf16.mxu0 %vm342_vm0, %v1962_v13  ;;  %v1010_v50 = vpack.c.bf16 %v996_v47, %v995_v46  ;;  %v316_v55 = vpack.c.bf16 %v295_v21, %v1950_v6  ;;  %v997_v57 = vsel %vm965_vm4, %v979_v51, 0.0 }
  0x28   : > { %1626 = vmatprep.subr.bf16.mxu0 %v1747_v14  ;;  %v998_v58 = vsel %vm965_vm4, %v981_v52, 0.0  ;;  %v1114_v62 = vpack.c.bf16 %v993_v42, %v992_v26  ;;  %v1115_v1 = vpack.c.bf16 %v995_v46, %v994_v43  ;;  %v1116_v3 = vpack.c.bf16 %v997_v57, %v996_v47 }
  0x29   : > { %1561 = vmatmul.mubr.msk.bf16.gmra.mrb[4].mxu1 %vm342_vm0, %v324_v23  ;;  %v1011_v61 = vpack.c.bf16 %v998_v58, %v997_v57  ;;  %v528_v9 = vpack.c.bf16 %v1763_v19, %v1979_v22  ;;  %v639_v6 = vpack.c.bf16 %v1865_v27, %v1763_v19  ;;  %v999_v10 = vsel %vm965_vm4, %v991_v4, 0.0 }
  0x2a   : > { %1568 = vmatprep.mubr.msk.bf16.mxu1 %vm342_vm0, %v313_v20  ;;  %v1117_v8 = vpack.c.bf16 %v999_v10, %v998_v58 }
  0x2b   : > { %1627 = vmatpush3.bf16.msra.mxu0 %v1747_v14 }
  0x2c   : > { %1636 = vmatprep.subr.bf16.mxu0 %v1749_v28 }
  0x2e   : > { %1621 = vmatmul.mubr.msk.bf16.gmra.mrb[4].mxu0 %vm342_vm0, %v862_v30 }
  0x2f   : > { %1628 = vmatprep.mubr.msk.bf16.mxu0 %vm342_vm0, %v1008_v34 }
  0x31   : > { %1569 = vmatmul.mubr.msk.bf16.vlgmr.msra.gmra.mrb[0].mxu1 %vm342_vm0, %v314_v37 }
  0x32   : > { %1577 = vmatpush3.bf16.msra.mxu1 %v1746_v5  ;;  %1572 = vmatprep.mubr.msk.bf16.mxu1 %vm342_vm0, %v315_v38  ;;  %v1754_v5 = vld [vmem:[%s2103_s3 + $0x88] sm:$0xff]  }
  0x33   : > { %1578 = vmatprep.subr.bf16.mxu1 %v1748_v41 }
  0x36   : > { %1579 = vmatpush3.bf16.msra.mxu1 %v1748_v41  ;;  %1629 = vmatmul.mubr.msk.bf16.vlgmr.msra.gmra.mrb[0].mxu0 %vm342_vm0, %v1009_v48 }
  0x37   : > { %1637 = vmatpush3.bf16.msra.mxu0 %v1749_v28  ;;  %1588 = vmatprep.subr.bf16.mxu1 %v1750_v49 }
  0x38   : > { %1632 = vmatprep.mubr.msk.bf16.mxu0 %vm342_vm0, %v1010_v50  ;;  %1638 = vmatprep.subr.bf16.mxu0 %v1751_v54 }
  0x39   : > { %1573 = vmatmul.mubr.msk.bf16.gmra.mrb[4].mxu1 %vm342_vm0, %v316_v55 }
  0x3a   : > { %1580 = vmatprep.mubr.msk.bf16.mxu1 %vm342_vm0, %v314_v37 }
  0x3b   : > { %1639 = vmatpush3.bf16.msra.mxu0 %v1751_v54 }
  0x3c   : > { %1648 = vmatprep.subr.bf16.mxu0 %v1753_v60 }
  0x3e   : > { %1633 = vmatmul.mubr.msk.bf16.gmra.mrb[4].mxu0 %vm342_vm0, %v1011_v61 }
  0x3f   : > { %1640 = vmatprep.mubr.msk.bf16.mxu0 %vm342_vm0, %v1114_v62 }
  0x41   : > { %1581 = vmatmul.mubr.msk.bf16.vlgmr.msra.gmra.mrb[0].mxu1 %vm342_vm0, %v315_v38 }
  0x42   : > { %1589 = vmatpush3.bf16.msra.mxu1 %v1750_v49  ;;  %1584 = vmatprep.mubr.msk.bf16.mxu1 %vm342_vm0, %v316_v55 }
  0x43   : > { %1590 = vmatprep.subr.bf16.mxu1 %v1752_v63 }
  0x46   : > { %1591 = vmatpush3.bf16.msra.mxu1 %v1752_v63  ;;  %1641 = vmatmul.mubr.msk.bf16.vlgmr.msra.gmra.mrb[0].mxu0 %vm342_vm0, %v1115_v1 }
  0x47   : > { %1649 = vmatpush3.bf16.msra.mxu0 %v1753_v60  ;;  %1660 = vmatprep.subr.bf16.mxu1 %v1800_v0 }
  0x48   : > { %1644 = vmatprep.mubr.msk.bf16.mxu0 %vm342_vm0, %v1116_v3  ;;  %1650 = vmatprep.subr.bf16.mxu0 %v1754_v5 }
  0x49   : > { %1585 = vmatmul.mubr.msk.bf16.gmra.mrb[4].mxu1 %vm342_vm0, %v528_v9 }
  0x4a   : > { %1592 = vmatprep.mubr.msk.bf16.mxu1 %vm342_vm0, %v639_v6 }
  0x4b   : > { %1651 = vmatpush3.bf16.msra.mxu0 %v1754_v5 }
  0x4e   : > { %1645 = vmatmul.mubr.msk.bf16.gmra.mrb[4].mxu0 %vm342_vm0, %v1117_v8 }
  0x4f   : > { %1652 = vmatprep.mubr.msk.bf16.mxu0 %vm342_vm0, %v1009_v48 }
  0x51   : > { %1593 = vmatmul.mubr.msk.bf16.vlgmr.msra.gmra.mrb[0].mxu1 %vm342_vm0, %v1926_v59 }
  0x52   : > { %1662 = vmatpush3.bf16.msra.mxu1 %v1800_v0  ;;  %1596 = vmatprep.mubr.msk.bf16.mxu1 %vm342_vm0, %v1957_v11  ;;  %v1231_v0 = vpack.c.bf16 %v1763_v19, %v999_v10 }
  0x53   : > { %1661 = vmatprep.subr.bf16.mxu1 %v1809_v2 }
  0x56   : > { %1653 = vmatmul.mubr.msk.bf16.vlgmr.msra.gmra.mrb[0].mxu0 %vm342_vm0, %v1010_v50  ;;  %1663 = vmatpush3.bf16.msra.mxu1 %v1809_v2 }
  0x57   : > { %1656 = vmatprep.mubr.msk.bf16.mxu0 %vm342_vm0, %v1011_v61 }
  0x59   : > { %1597 = vmatmul.mubr.msk.bf16.gmra.mrb[4].mxu1 %vm342_vm0, %v1962_v13 }
  0x5a   : > { %1608 = vmatprep.mubr.msk.bf16.mxu1 %vm342_vm0, %v747_v18 }
  0x5e   : > { %1657 = vmatmul.mubr.msk.bf16.gmra.mrb[4].mxu0 %vm342_vm0, %v1231_v0 }
  0x65   : > { %1609 = vmatmul.mubr.msk.bf16.vlgmr.msra.gmra.mrb[4].mxu1 %vm342_vm0, %v748_v29 }
 0x124   : > { %v1594_v2 = vpop.f32.mrb[0].mxu1 }
 0x125   : > { %v706_v27 = vpop.f32.mrb[1].mxu1 }
 0x126   : > { %v1595_v59 = vpop.f32.mrb[2].mxu1 }
 0x127   : > { %v709_v53 = vpop.f32.mrb[3].mxu1 }
 0x129   : > { %v1654_v56 = vpop.f32.mrb[0].mxu0 }
 0x12a   : > { %v1664_v11 = vadd.f32 %v1654_v56, %v1594_v2  ;;  %v1295_v12 = vpop.f32.mrb[1].mxu0 }
 0x12b   : > { %v1665_v13 = vadd.f32 %v1295_v12, %v706_v27  ;;  %v1655_v14 = vpop.f32.mrb[2].mxu0 }
 0x12c   : > { %1336 = vst [vmem:[%s197_s14 + $0x10] sm:$0xff] %v1664_v11  ;;  %v1666_v15 = vadd.f32 %v1655_v14, %v1595_v59  ;;  %v1298_v16 = vpop.f32.mrb[3].mxu0 }
 0x12d   : > { %1334 = vst [vmem:[%s197_s14] sm:$0xff] %v1665_v13  ;;  %v1667_v32 = vadd.f32 %v1298_v16, %v709_v53 }
 0x12e   : > { %1337 = vst [vmem:[%s197_s14 + $0x18] sm:$0xff] %v1666_v15 }
 0x12f   : > { %1335 = vst [vmem:[%s197_s14 + $0x8] sm:$0xff] %v1667_v32 }
 0x131   : > { %v1658_v7 = vpop.f32.mrb[4].mxu0 }
 0x132   : > { %v1311_v17 = vpop.f32.mrb[5].mxu0 }
 0x133   : > { %v1659_v19 = vpop.f32.mrb[6].mxu0 }
 0x134   : > { %v1314_v20 = vpop.f32.mrb[7].mxu0 }
 0x138   : > { %v1610_v21 = vpop.f32.mrb[4].mxu1 }
 0x139   : > { %v1668_v22 = vadd.f32 %v1658_v7, %v1610_v21  ;;  %v828_v23 = vpop.f32.mrb[5].mxu1 }
 0x13a   : > { %v1669_v24 = vadd.f32 %v1311_v17, %v828_v23  ;;  %v1611_v25 = vpop.f32.mrb[6].mxu1 }
 0x13b   : > { %1340 = vst [vmem:[%s197_s14 + $0x30] sm:$0xff] %v1668_v22  ;;  %v1670_v26 = vadd.f32 %v1659_v19, %v1611_v25  ;;  %v831_v28 = vpop.f32.mrb[7].mxu1 }
 0x13c   : > { %1338 = vst [vmem:[%s197_s14 + $0x20] sm:$0xff] %v1669_v24  ;;  %v1671_v30 = vadd.f32 %v1314_v20, %v831_v28 }
 0x13d   : > { %1341 = vst [vmem:[%s197_s14 + $0x38] sm:$0xff] %v1670_v26 }
 0x13e   : > { %1339 = vst [vmem:[%s197_s14 + $0x28] sm:$0xff] %v1671_v30 }
 0x13f PF: > { %s14_s15 = sadd.s32 1, %s1761_s15  }
 0x140   : > { %p11_p4 = scmp.ge.s32.totalorder %s14_s15, 4  }
 0x142   :  { %13 = sbr.rel (!%p11_p4) target bundleno = 1 (0x1), region = 74 }

// kernel: dense_block.3
= control target key start
LH: loop header
LB: loop body
LE: loop exit
PB: predicated region body
PF: predicated region fallthrough
CT: control target
= control target key end

     0   :  { %s4137_s27 = smov 0   ;;  %s5010_s0 = inlined_call_operand.vmem [shape: f32[2,64,32], index: 0, kind: input, shape index: {}]   ;;  %s5011_s1 = inlined_call_operand.vmem [shape: f32[2,64,128], index: 1, kind: input, shape index: {}]   ;;  %s5012_s2 = inlined_call_operand.vmem [shape: f32[1,32], index: 2, kind: input, shape index: {}]   ;;  %s5013_s3 = inlined_call_operand.vmem [shape: f32[1,128], index: 3, kind: input, shape index: {}]   ;;  %s5014_s4 = inlined_call_operand.vmem [shape: f32[1,32], index: 4, kind: input, shape index: {}]   ;;  %s5015_s5 = inlined_call_operand.vmem [shape: f32[1,128], index: 5, kind: input, shape index: {}]   ;;  %s5016_s6 = inlined_call_operand.vmem [shape: bf16[9,32,128], index: 6, kind: input, shape index: {}]   ;;  %s5017_s7 = inlined_call_operand.vmem [shape: bf16[9,128,128], index: 7, kind: input, shape index: {}]   ;;  %s5018_s8 = inlined_call_operand.vmem [shape: f32[2,64,128], index: 8, kind: output, shape index: {}]  }
   0x1 LB: > { %s2982_s28 = sadd.s32 4294967295, %s4088_s27   ;;  %p2986_p0 = scmp.ge.s32.totalorder %s4088_s27, 1  ;;  %s4088_s27 = sphi %s4137_s27, %s18_s27  }
   0x2   : > { %p272_p1 = scmp.lt.s32.totalorder %s4088_s27, 3 }
   0x4   : > { %p273_p2 = pnand %p2986_p0, %p272_p1 }
   0x5   : > { %v3992_v0 = vld [vmem:[%s5016_s6 + $0x30] sm:$0xff] (!%p273_p2)   ;;  %p311_p3 = scmp.lt.s32.totalorder (!%p273_p2), %s2982_s28, 1  ;;  %v3993_v1 = vld [vmem:[%s5016_s6] sm:$0xff] (!%p273_p2)   ;;  %v3994_v2 = vld [vmem:[%s5016_s6 + $0x38] sm:$0xff] (!%p273_p2)   ;;  %v373_v5 = vlaneseq (!%p273_p2)  ;;  %vm393_vm0 = vcmask (!%p273_p2), 1040384   ;;  %vm470_vm1 = vcmask (!%p273_p2), 261120  }
   0x6   : > { %276 = sbr.rel (%p273_p2) target bundleno = 466 (0x1d2), region = 52  ;;  %3522 = vmatprep.subr.bf16.mxu1 (!%p273_p2), %v3992_v0  ;;  %3534 = vmatprep.subr.bf16.mxu0 (!%p273_p2), %v3993_v1  ;;  %v3995_v3 = vld [vmem:[%s5016_s6 + $0x8] sm:$0xff] (!%p273_p2)   ;;  %v2993_v4 = vld [vmem:[%s5012_s2] ss:$0 sm:$0xff] (!%p273_p2)  ;;  %v4090_v55 = vmov (!%p273_p2), 0.0   ;;  %vm1094_vm3 = vcmask (!%p273_p2), 1046528  }
   0x7   : > { %3523 = vmatpush3.bf16.msra.mxu1 (!%p273_p2), %v3992_v0  ;;  %3535 = vmatpush3.bf16.msra.mxu0 (!%p273_p2), %v3993_v1  ;;  %v4171_v6 = vld [vmem:[%s5014_s4] ss:$0 sm:$0xff] (!%p273_p2)  ;;  %v4183_v18 = vshrl.u32 (!%p273_p2), %v373_v5, 7  ;;  %v3998_v58 = vld [vmem:[%s5017_s7 + $0x8] sm:$0xff] (!%p273_p2)   ;;  %v4000_v1 = vld [vmem:[%s5017_s7 + $0x10] sm:$0xff] (!%p273_p2)   ;;  %vm4091_vm4 = vmmov (!%p273_p2), 1  }
   0x8   : > { %3524 = vmatprep.subr.bf16.mxu1 (!%p273_p2), %v3994_v2  ;;  %3536 = vmatprep.subr.bf16.mxu0 (!%p273_p2), %v3995_v3  ;;  %v4176_v7 = vld [vmem:[%s5016_s6 + $0x60] sm:$0xff] (!%p273_p2)   ;;  %v3999_v62 = vld [vmem:[%s5016_s6 + $0x68] sm:$0xff] (!%p273_p2)  }
   0x9   : > { %v3997_v19 = vld [vmem:[%s5017_s7] sm:$0xff] (!%p273_p2)   ;;  %vm382_vm2 = vcmp.ge.s32.totalorder (!%p273_p2), %v4183_v18, 1  ;;  %vm1093_vm6 = vcmp.le.s32.totalorder (!%p273_p2), %v4183_v18, 6 }
   0xa   : > { %vm4334_vm5 = vmpackc.low (!%p273_p2), %vm382_vm2, %vm4091_vm4 }
   0xb   : > { %3525 = vmatpush3.bf16.msra.mxu1 (!%p273_p2), %v3994_v2  ;;  %3537 = vmatpush3.bf16.msra.mxu0 (!%p273_p2), %v3995_v3  ;;  %v4266_v3 = vld [vmem:[%s5016_s6 + $0x10] sm:$0xff] (!%p273_p2)   ;;  %vm4478_vm7 = vmpackc.low (!%p273_p2), %vm382_vm2, %vm382_vm2 }
   0xc   : > { %3546 = vmatprep.subr.bf16.mxu0 (!%p273_p2), %v4176_v7  ;;  %3630 = vmatprep.subr.bf16.mxu1 (!%p273_p2), %v3997_v19  ;;  %vm3172_vm8 = vmpackc.low (!%p273_p2), %vm4091_vm4, %vm382_vm2 }
   0xd   : > { %s5033_s28 = smov (!%p311_p3, %s2982_s28), 1  ;;  %vm3271_vm9 = vmpackc.low %vm1093_vm6, %vm4091_vm4 }
   0xe   : > { %s4157_s15 = sshll.u32 %s5033_s28, 6  ;;  %vm4864_vm10 = vmpackc.low %vm1093_vm6, %vm1093_vm6 }
   0xf   : > { %s4166_s20 = scalar_lea.vmem %s5010_s0, %s4157_s15  ;;  %s4237_s30 = scalar_lea.vmem %s5011_s1, %s4157_s15  ;;  %vm3352_vm11 = vmpackc.low %vm4091_vm4, %vm1093_vm6 }
  0x10   : > { %v327_v8 = vld [vmem:[%s4166_s20] sm:$0xff]  ;;  %v328_v9 = vld [vmem:[%s4166_s20 + $0x8] sm:$0xff]  ;;  %v329_v10 = vld [vmem:[%s4166_s20 + $0x10] sm:$0xff]  ;;  %s325_s24 = scalar_lea.vmem %s5018_s8, %s4157_s15 }
  0x11   : > { %v330_v11 = vld [vmem:[%s4166_s20 + $0x18] sm:$0xff]  ;;  %v343_v13 = vmul.f32 %v2993_v4, %v327_v8  ;;  %v344_v14 = vmul.f32 %v2993_v4, %v328_v9  ;;  %v345_v15 = vmul.f32 %v2993_v4, %v329_v10  ;;  %v331_v25 = vld [vmem:[%s4166_s20 + $0x20] sm:$0xff]  ;;  %v332_v32 = vld [vmem:[%s4166_s20 + $0x28] sm:$0xff] }
  0x12   : > { %v334_v12 = vld [vmem:[%s4166_s20 + $0x38] sm:$0xff]  ;;  %v346_v16 = vmul.f32 %v2993_v4, %v330_v11  ;;  %v347_v29 = vmul.f32 %v2993_v4, %v331_v25  ;;  %v333_v37 = vld [vmem:[%s4166_s20 + $0x30] sm:$0xff]  ;;  %v348_v40 = vmul.f32 %v2993_v4, %v332_v32  ;;  %v1462_v5 = vld [vmem:[%s4237_s30] sm:$0xff] }
  0x13   : > { %v350_v17 = vmul.f32 %v2993_v4, %v334_v12  ;;  %v357_v20 = vadd.f32 %v4171_v6, %v343_v13  ;;  %v358_v21 = vadd.f32 %v4171_v6, %v344_v14  ;;  %v359_v22 = vadd.f32 %v4171_v6, %v345_v15  ;;  %v1469_v9 = vld [vmem:[%s4237_s30 + $0x38] sm:$0xff]  ;;  %v4279_v10 = vld [vmem:[%s5013_s3] ss:$0 sm:$0xff] }
  0x14   : > { %v360_v23 = vadd.f32 %v4171_v6, %v346_v16  ;;  %v361_v36 = vadd.f32 %v4171_v6, %v347_v29  ;;  %v349_v44 = vmul.f32 %v2993_v4, %v333_v37  ;;  %v362_v57 = vadd.f32 %v4171_v6, %v348_v40 }
  0x15   : > { %v364_v24 = vadd.f32 %v4171_v6, %v350_v17  ;;  %v4195_v26 = vmax.f32 %v357_v20, 0.0  ;;  %v4197_v27 = vmax.f32 %v358_v21, 0.0  ;;  %v4199_v28 = vmax.f32 %v359_v22, 0.0  ;;  %v1464_v20 = vld [vmem:[%s4237_s30 + $0x10] sm:$0xff]  ;;  %v4001_v22 = vld [vmem:[%s5017_s7 + $0x18] sm:$0xff]  }
  0x16   : > { %v4201_v30 = vmax.f32 %v360_v23, 0.0  ;;  %v4216_v43 = vmax.f32 %v361_v36, 0.0  ;;  %v363_v60 = vadd.f32 %v4171_v6, %v349_v44  ;;  %v4251_v63 = vmax.f32 %v362_v57, 0.0  ;;  %v1463_v6 = vld [vmem:[%s4237_s30 + $0x8] sm:$0xff] }
  0x17   : > { %v4203_v31 = vmax.f32 %v364_v24, 0.0  ;;  %v394_v33 = vrot.slane %v4195_v26, 7  ;;  %v395_v34 = vrot.slane %v4197_v27, 7  ;;  %v397_v35 = vrot.slane %v4199_v28, 7 }
  0x18   : > { %v399_v39 = vrot.slane %v4201_v30, 7  ;;  %v401_v52 = vrot.slane %v4216_v43, 7  ;;  %v4261_v2 = vmax.f32 %v363_v60, 0.0  ;;  %v403_v4 = vrot.slane %v4251_v63, 7  ;;  %v1468_v60 = vld [vmem:[%s4237_s30 + $0x30] sm:$0xff] }
  0x19   : > { %v384_v38 = vrot.slane %v4203_v31, 7  ;;  %v396_v41 = vsel %vm393_vm0, %v394_v33, %v395_v34  ;;  %v398_v42 = vsel %vm393_vm0, %v395_v34, %v397_v35  ;;  %v1478_v12 = vmul.f32 %v4279_v10, %v1462_v5 }
  0x1a   : > { %v400_v45 = vsel %vm393_vm0, %v397_v35, %v399_v39  ;;  %v418_v47 = vsel %vm382_vm2, %v396_v41, 0.0  ;;  %v419_v48 = vsel %vm382_vm2, %v398_v42, 0.0  ;;  %v402_v59 = vsel %vm393_vm0, %v399_v39, %v401_v52  ;;  %v4003_v41 = vld [vmem:[%s5017_s7 + $0x20] sm:$0xff]  }
  0x1b   : > { %v416_v46 = vsel %vm393_vm0, %v384_v38, %v394_v33  ;;  %v420_v50 = vsel %vm382_vm2, %v400_v45, 0.0  ;;  %v4228_v51 = vpack.c.bf16 %v419_v48, %v418_v47  ;;  %v421_v61 = vsel %vm382_vm2, %v402_v59, 0.0  ;;  %v1467_v59 = vld [vmem:[%s4237_s30 + $0x28] sm:$0xff] }
  0x1c   : > { %v417_v49 = vsel %vm382_vm2, %v416_v46, 0.0  ;;  %v450_v54 = vpack.c.bf16 %v420_v50, %v419_v48  ;;  %v4256_v0 = vpack.c.bf16 %v421_v61, %v420_v50  ;;  %v405_v8 = vrot.slane %v4261_v2, 7 }
  0x1d   : > { %v449_v53 = vpack.c.bf16 %v418_v47, %v417_v49  ;;  %v441_v56 = vpack.c.bf16 %v417_v49, %v4090_v55  ;;  %v404_v11 = vsel %vm393_vm0, %v401_v52, %v403_v4  ;;  %v1485_v13 = vmul.f32 %v4279_v10, %v1469_v9  ;;  %v4004_v47 = vld [vmem:[%s5017_s7 + $0x28] sm:$0xff]   ;;  %v1465_v52 = vld [vmem:[%s4237_s30 + $0x18] sm:$0xff] }
  0x1e   : > { %v1095_v14 = vrot.slane %v4195_v26, 1  ;;  %v406_v15 = vsel %vm393_vm0, %v403_v4, %v405_v8  ;;  %v422_v16 = vsel %vm382_vm2, %v404_v11, 0.0  ;;  %v407_v17 = vsel %vm393_vm0, %v405_v8, %v384_v38 }
  0x1f   : > { %3526 = vmatprep.mubr.msk.bf16.mxu1 %vm470_vm1, %v449_v53  ;;  %3538 = vmatprep.mubr.msk.bf16.mxu0 %vm470_vm1, %v441_v56  ;;  %v423_v21 = vsel %vm382_vm2, %v406_v15, 0.0  ;;  %v451_v23 = vpack.c.bf16 %v422_v16, %v421_v61  ;;  %v4303_v24 = vsel %vm382_vm2, %v407_v17, 0.0  ;;  %v1480_v35 = vmul.f32 %v4279_v10, %v1464_v20  ;;  %v1466_v53 = vld [vmem:[%s4237_s30 + $0x20] sm:$0xff] }
  0x20   : > { %3527 = vmatmul.mubr.msk.bf16.vlgmr.msra.gmra.mrb[0].mxu1 %vm470_vm1, %v450_v54  ;;  %3539 = vmatmul.mubr.msk.bf16.vlgmr.msra.gmra.mrb[0].mxu0 %vm470_vm1, %v4228_v51  ;;  %v444_v29 = vpack.c.bf16 %v423_v21, %v422_v16  ;;  %v452_v32 = vpack.c.bf16 %v4303_v24, %v423_v21  ;;  %v1096_v36 = vrot.slane %v4197_v27, 1  ;;  %v1098_v44 = vrot.slane %v4199_v28, 1  ;;  %v4005_v54 = vld [vmem:[%s5016_s6 + $0x18] sm:$0xff]  }
  0x21   : > { %3547 = vmatpush3.bf16.msra.mxu0 %v4176_v7  ;;  %3631 = vmatpush3.bf16.msra.mxu1 %v3997_v19  ;;  %v4284_v7 = vld [vmem:[%s5015_s5] ss:$0 sm:$0xff]  ;;  %v1479_v19 = vmul.f32 %v4279_v10, %v1463_v6  ;;  %v1481_v57 = vmul.f32 %v4279_v10, %v1465_v52  ;;  %v1483_v61 = vmul.f32 %v4279_v10, %v1467_v59 }
  0x22   : > { %3632 = vmatprep.subr.bf16.mxu1 %v3998_v58  ;;  %3542 = vmatprep.mubr.msk.bf16.mxu0 %vm470_vm1, %v4256_v0  ;;  %v1492_v25 = vadd.f32 %v4284_v7, %v1478_v12  ;;  %v1499_v33 = vadd.f32 %v4284_v7, %v1485_v13  ;;  %v1494_v40 = vadd.f32 %v4284_v7, %v1480_v35  ;;  %v1102_v12 = vrot.slane %v4216_v43, 1  ;;  %v4006_v13 = vld [vmem:[%s5017_s7 + $0x30] sm:$0xff]  }
  0x23   : > { %3548 = vmatprep.subr.bf16.mxu0 %v3999_v62  ;;  %3530 = vmatprep.mubr.msk.bf16.mxu1 %vm470_vm1, %v451_v23  ;;  %v1493_v37 = vadd.f32 %v4284_v7, %v1479_v19  ;;  %v1097_v42 = vsel %vm1094_vm3, %v1095_v14, %v1096_v36  ;;  %v1099_v48 = vsel %vm1094_vm3, %v1096_v36, %v1098_v44  ;;  %v4007_v23 = vld [vmem:[%s5017_s7 + $0x38] sm:$0xff]  }
  0x24   : > { %v4310_v34 = vmax.f32 %v1492_v25, 0.0  ;;  %v4319_v38 = vmax.f32 %v1499_v33, 0.0  ;;  %v1495_v4 = vadd.f32 %v4284_v7, %v1481_v57  ;;  %v4379_v6 = vsel %vm1093_vm6, %v1097_v42, 0.0 }
  0x25   : > { %3633 = vmatpush3.bf16.msra.mxu1 %v3998_v58  ;;  %3549 = vmatpush3.bf16.msra.mxu0 %v3999_v62  ;;  %v4343_v49 = vmax.f32 %v1493_v37, 0.0  ;;  %v1482_v58 = vmul.f32 %v4279_v10, %v1466_v53  ;;  %v1100_v62 = vrot.slane %v4201_v30, 1  ;;  %v4383_v8 = vsel %vm1093_vm6, %v1099_v48, 0.0 }
  0x26   : > { %3634 = vmatprep.subr.bf16.mxu1 %v4000_v1  ;;  %3558 = vmatprep.subr.bf16.mxu0 %v4266_v3  ;;  %v1518_v39 = vrot.slane %v4310_v34, 7  ;;  %v1509_v45 = vrot.slane %v4319_v38, 7  ;;  %v1497_v9 = vadd.f32 %v4284_v7, %v1483_v61  ;;  %v4403_v17 = vmax.f32 %v1495_v4, 0.0 }
  0x27   : > { %v1496_v5 = vadd.f32 %v4284_v7, %v1482_v58  ;;  %v1101_v11 = vsel %vm1094_vm3, %v1098_v44, %v1100_v62  ;;  %v1103_v21 = vsel %vm1094_vm3, %v1100_v62, %v1102_v12  ;;  %v767_v25 = vpack.c.bf16 %v4195_v26, %v4090_v55 }
  0x28   : > { %3543 = vmatmul.mubr.msk.bf16.gmra.mrb[4].mxu0 %vm470_vm1, %v444_v29  ;;  %3531 = vmatmul.mubr.msk.bf16.gmra.mrb[4].mxu1 %vm470_vm1, %v452_v32  ;;  %v4350_v50 = vsel %vm393_vm0, %v1509_v45, %v1518_v39  ;;  %v1523_v35 = vrot.slane %v4403_v17, 7  ;;  %v4438_v37 = vsel %vm1093_vm6, %v1101_v11, 0.0  ;;  %v1104_v42 = vrot.slane %v4251_v63, 1  ;;  %v4010_v11 = vld [vmem:[%s5017_s7 + $0xc8] sm:$0xff]  }
  0x29   : > { %3635 = vmatpush3.bf16.msra.mxu1 %v4000_v1  ;;  %3550 = vmatprep.mubr.msk.bf16.mxu0 %vm470_vm1, %v4228_v51  ;;  %v4352_v51 = vmax.f32 %v1494_v40, 0.0  ;;  %v3092_v56 = vpack.c.bf16 %v4350_v50, %v4090_v55  ;;  %v4405_v19 = vmax.f32 %v1496_v5, 0.0  ;;  %v4455_v44 = vsel %vm1093_vm6, %v1103_v21, 0.0 }
  0x2a   : > { %3636 = vmatprep.subr.bf16.mxu1 %v4001_v22  ;;  %v4459_v46 = vpack.c.bf16 %v4199_v28, %v4197_v27  ;;  %v4467_v48 = vpack.c.bf16 %v4216_v43, %v4201_v30  ;;  %v1108_v57 = vrot.slane %v4203_v31, 1  ;;  %v875_v16 = vpack.c.bf16 %v4251_v63, %v4216_v43 }
  0x2b   : > { %v4369_v1 = vpack.c.bf16 %v4352_v51, %v4343_v49  ;;  %3646 = vmatprep.mubr.msk.bf16.mxu1 %vm4334_vm5, %v3092_v56  ;;  %v1521_v15 = vrot.slane %v4352_v51, 7  ;;  %v1525_v36 = vrot.slane %v4405_v19, 7  ;;  %v1106_v56 = vrot.slane %v4261_v2, 1 }
  0x2c   : > { %v876_v43 = vpack.c.bf16 %v4203_v31, %v4261_v2 }
  0x2d   : > { %3637 = vmatpush3.bf16.msra.mxu1 %v4001_v22  ;;  %v656_v22 = vpack.c.bf16 %v4090_v55, %v4303_v24  ;;  %v4483_v59 = vsel %vm393_vm0, %v1521_v15, %v1523_v35  ;;  %v1107_v5 = vsel %vm1094_vm3, %v1104_v42, %v1106_v56 }
  0x2e   : > { %3638 = vmatprep.subr.bf16.mxu1 %v4003_v41 }
  0x30   : > { %3551 = vmatmul.mubr.msk.bf16.vlgmr.msra.gmra.mrb[0].mxu0 %vm470_vm1, %v4256_v0  ;;  %v1484_v0 = vmul.f32 %v4279_v10, %v1468_v60  ;;  %v1519_v10 = vrot.slane %v4343_v49, 7  ;;  %v4486_v60 = vsel %vm393_vm0, %v1523_v35, %v1525_v36 }
  0x31   : > { %3559 = vmatpush3.bf16.msra.mxu0 %v4266_v3  ;;  %3639 = vmatpush3.bf16.msra.mxu1 %v4003_v41  ;;  %v4397_v3 = vld [vmem:[%s5016_s6 + $0x40] sm:$0xff]   ;;  %v4450_v41 = vpack.c.bf16 %v4438_v37, %v4383_v8 }
  0x32   : > { %3640 = vmatprep.subr.bf16.mxu1 %v4004_v47  ;;  %3554 = vmatprep.mubr.msk.bf16.mxu0 %vm470_vm1, %v444_v29  ;;  %v1498_v20 = vadd.f32 %v4284_v7, %v1484_v0  ;;  %v4416_v29 = vmax.f32 %v1497_v9, 0.0  ;;  %v4422_v7 = vpack.c.bf16 %v4405_v19, %v4403_v17  ;;  %v4428_v24 = vsel %vm393_vm0, %v1518_v39, %v1519_v10  ;;  %v4009_v39 = vld [vmem:[%s5017_s7 + $0xc0] sm:$0xff]  }
  0x33   : > { %3560 = vmatprep.subr.bf16.mxu0 %v4005_v54  ;;  %v4431_v33 = vsel %vm393_vm0, %v1519_v10, %v1521_v15  ;;  %v1109_v0 = vsel %vm1094_vm3, %v1106_v56, %v1108_v57  ;;  %v1119_v9 = vsel %vm1094_vm3, %v1108_v57, %v1095_v14  ;;  %v2432_v56 = vrot.slane %v4310_v34, 1 }
  0x34   : > { %v4418_v32 = vmax.f32 %v1498_v20, 0.0  ;;  %v1527_v53 = vrot.slane %v4416_v29, 7  ;;  %v4514_v10 = vsel %vm1093_vm6, %v1109_v0, 0.0  ;;  %v4522_v20 = vpack.c.bf16 %v4486_v60, %v4483_v59 }
  0x35   : > { %3641 = vmatpush3.bf16.msra.mxu1 %v4004_v47  ;;  %3561 = vmatpush3.bf16.msra.mxu0 %v4005_v54  ;;  %v4463_v47 = vpack.c.bf16 %v4431_v33, %v4428_v24  ;;  %v1105_v54 = vsel %vm1094_vm3, %v1102_v12, %v1104_v42  ;;  %v4011_v12 = vld [vmem:[%s5016_s6 + $0x48] sm:$0xff]   ;;  %v2437_v0 = vrot.slane %v4403_v17, 1  ;;  %v2439_v14 = vrot.slane %v4405_v19, 1 }
  0x36   : > { %3642 = vmatprep.subr.bf16.mxu1 %v4006_v13  ;;  %3570 = vmatprep.subr.bf16.mxu0 %v4397_v3  ;;  %v4442_v40 = vpack.c.bf16 %v4418_v32, %v4416_v29  ;;  %v1529_v61 = vrot.slane %v4418_v32, 7  ;;  %v4491_v62 = vsel %vm1093_vm6, %v1105_v54, 0.0  ;;  %v4544_v35 = vsel %vm393_vm0, %v1525_v36, %v1527_v53  ;;  %v4013_v54 = vld [vmem:[%s5017_s7 + $0xd8] sm:$0xff]  }
  0x37   : > { %v4495_v4 = vpack.c.bf16 %v4491_v62, %v4455_v44  ;;  %v2433_v36 = vrot.slane %v4343_v49, 1 }
  0x38   : > { %3555 = vmatmul.mubr.msk.bf16.gmra.mrb[4].mxu0 %vm470_vm1, %v656_v22  ;;  %v4549_v42 = vsel %vm393_vm0, %v1527_v53, %v1529_v61  ;;  %v4566_v53 = vpack.c.bf16 %v4261_v2, %v4251_v63  ;;  %v3128_v22 = vpack.c.bf16 %v4428_v24, %v4350_v50  ;;  %v2142_v63 = vpack.c.bf16 %v4416_v29, %v4405_v19  ;;  %v4021_v2 = vld [vmem:[%s5017_s7 + $0x180] sm:$0xff]  }
  0x39   : > { %3643 = vmatpush3.bf16.msra.mxu1 %v4006_v13  ;;  %3562 = vmatprep.mubr.msk.bf16.mxu0 %vm470_vm1, %v767_v25  ;;  %v4510_v13 = vsel %vm1093_vm6, %v1107_v5, 0.0  ;;  %v4012_v25 = vld [vmem:[%s5017_s7 + $0xd0] sm:$0xff]   ;;  %v4570_v57 = vpack.c.bf16 %v4549_v42, %v4544_v35  ;;  %v4575_v5 = vsel %vm1094_vm3, %v2432_v56, %v2433_v36  ;;  %v4070_v19 = vld [vmem:[%s5017_s7 + $0x1e0] sm:$0xff]  }
  0x3a   : > { %3644 = vmatprep.subr.bf16.mxu1 %v4007_v23  ;;  %v4526_v21 = vpack.c.bf16 %v4514_v10, %v4510_v13 }
  0x3d   : > { %3645 = vmatpush3.bf16.msra.mxu1 %v4007_v23  ;;  %v4537_v23 = vsel %vm1093_vm6, %v1119_v9, 0.0  ;;  %v873_v9 = vpack.c.bf16 %v4197_v27, %v4195_v26  ;;  %v4598_v27 = vsel %vm1094_vm3, %v2437_v0, %v2439_v14 }
  0x3e   : > { %3654 = vmatprep.subr.bf16.mxu1 %v4009_v39  ;;  %v5026_v58 = vpack.c.bf16 %v4537_v23, %v4514_v10  ;;  %v4041_v10 = vld [vmem:[%s5017_s7 + $0x88] sm:$0xff]  }
  0x40   : > { %3563 = vmatmul.mubr.msk.bf16.vlgmr.msra.gmra.mrb[0].mxu0 %vm470_vm1, %v4459_v46  ;;  %3647 = vmatmul.mubr.msk.bf16.vlgmr.msra.gmra.mrb[8].mxu1 %vm4478_vm7, %v4463_v47 }
  0x41   : > { %3571 = vmatpush3.bf16.msra.mxu0 %v4397_v3  ;;  %3655 = vmatpush3.bf16.msra.mxu1 %v4009_v39  ;;  %v4014_v3 = vld [vmem:[%s5016_s6 + $0x70] sm:$0xff]   ;;  %v2435_v39 = vrot.slane %v4352_v51, 1 }
  0x42   : > { %3656 = vmatprep.subr.bf16.mxu1 %v4010_v11  ;;  %3566 = vmatprep.mubr.msk.bf16.mxu0 %vm470_vm1, %v4467_v48 }
  0x43   : > { %3572 = vmatprep.subr.bf16.mxu0 %v4011_v12  ;;  %3650 = vmatprep.mubr.msk.bf16.mxu1 %vm4478_vm7, %v4522_v20  ;;  %v4581_v15 = vsel %vm1094_vm3, %v2433_v36, %v2435_v39  ;;  %v2443_v36 = vrot.slane %v4418_v32, 1 }
  0x45   : > { %3657 = vmatpush3.bf16.msra.mxu1 %v4010_v11  ;;  %3573 = vmatpush3.bf16.msra.mxu0 %v4011_v12  ;;  %v4590_v11 = vsel %vm1094_vm3, %v2435_v39, %v2437_v0  ;;  %v2441_v12 = vrot.slane %v4416_v29, 1  ;;  %v2445_v39 = vrot.slane %v4319_v38, 1  ;;  %v4071_v29 = vld [vmem:[%s5017_s7 + $0x200] sm:$0xff]  }
  0x46   : > { %3658 = vmatprep.subr.bf16.mxu1 %v4012_v25  ;;  %3582 = vmatprep.subr.bf16.mxu0 %v4014_v3  ;;  %v4595_v26 = vpack.c.bf16 %v4590_v11, %v4581_v15 }
  0x47   : > { %v4607_v50 = vsel %vm1094_vm3, %v2439_v14, %v2441_v12  ;;  %v4618_v52 = vsel %vm1094_vm3, %v2441_v12, %v2443_v36  ;;  %v4015_v14 = vld [vmem:[%s5017_s7 + $0xe0] sm:$0xff]   ;;  %v4626_v24 = vsel %vm1094_vm3, %v2443_v36, %v2445_v39  ;;  %v4016_v12 = vld [vmem:[%s5017_s7 + $0xe8] sm:$0xff]   ;;  %v4017_v36 = vld [vmem:[%s5016_s6 + $0x78] sm:$0xff]  }
  0x48   : > { %3567 = vmatmul.mubr.msk.bf16.gmra.mrb[4].mxu0 %vm470_vm1, %v4566_v53  ;;  %3651 = vmatmul.mubr.msk.bf16.gmra.mrb[12].mxu1 %vm4478_vm7, %v4570_v57  ;;  %v4615_v0 = vpack.c.bf16 %v4607_v50, %v4598_v27 }
  0x49   : > { %3659 = vmatpush3.bf16.msra.mxu1 %v4012_v25  ;;  %3574 = vmatprep.mubr.msk.bf16.mxu0 %vm470_vm1, %v873_v9  ;;  %v4630_v25 = vpack.c.bf16 %v4626_v24, %v4618_v52  ;;  %v874_v9 = vpack.c.bf16 %v4201_v30, %v4199_v28  ;;  %v4018_v28 = vld [vmem:[%s5017_s7 + $0xf0] sm:$0xff]   ;;  %v4020_v30 = vld [vmem:[%s5016_s6 + $0x20] sm:$0xff]  }
  0x4a   : > { %3660 = vmatprep.subr.bf16.mxu1 %v4013_v54  ;;  %3670 = vmatprep.mubr.msk.bf16.mxu1 %vm4478_vm7, %v3128_v22  ;;  %v3308_v22 = vpack.c.bf16 %v4581_v15, %v4575_v5  ;;  %v4066_v15 = vld [vmem:[%s5017_s7 + $0x1d0] sm:$0xff]  }
  0x4d   : > { %3661 = vmatpush3.bf16.msra.mxu1 %v4013_v54  ;;  %v2143_v54 = vpack.c.bf16 %v4319_v38, %v4418_v32  ;;  %v4072_v32 = vld [vmem:[%s5017_s7 + $0x1e8] sm:$0xff]  }
  0x4e   : > { %3662 = vmatprep.subr.bf16.mxu1 %v4015_v14 }
  0x50   : > { %3575 = vmatmul.mubr.msk.bf16.vlgmr.msra.gmra.mrb[0].mxu0 %vm470_vm1, %v874_v9  ;;  %v4023_v9 = vld [vmem:[%s5016_s6 + $0x28] sm:$0xff]  }
  0x51   : > { %3583 = vmatpush3.bf16.msra.mxu0 %v4014_v3  ;;  %3663 = vmatpush3.bf16.msra.mxu1 %v4015_v14  ;;  %v3131_v3 = vpack.c.bf16 %v4483_v59, %v4431_v33  ;;  %v4022_v14 = vld [vmem:[%s5017_s7 + $0x188] sm:$0xff]   ;;  %v4024_v33 = vld [vmem:[%s5017_s7 + $0x190] sm:$0xff]   ;;  %v1531_v59 = vsel %vm393_vm0, %v1529_v61, %v1509_v45  ;;  %v1136_v45 = vpack.c.bf16 %v4379_v6, %v4090_v55 }
  0x52   : > { %3664 = vmatprep.subr.bf16.mxu1 %v4016_v12  ;;  %3578 = vmatprep.mubr.msk.bf16.mxu0 %vm470_vm1, %v875_v16  ;;  %v4019_v16 = vld [vmem:[%s5017_s7 + $0xf8] sm:$0xff]   ;;  %v3314_v61 = vpack.c.bf16 %v4618_v52, %v4607_v50  ;;  %v4078_v52 = vld [vmem:[%s5017_s7 + $0x220] sm:$0xff]   ;;  %v4079_v50 = vld [vmem:[%s5017_s7 + $0x228] sm:$0xff]  }
  0x53   : > { %3584 = vmatprep.subr.bf16.mxu0 %v4017_v36 }
  0x55   : > { %3665 = vmatpush3.bf16.msra.mxu1 %v4016_v12  ;;  %3585 = vmatpush3.bf16.msra.mxu0 %v4017_v36  ;;  %v4029_v12 = vld [vmem:[%s5016_s6 + $0x58] sm:$0xff]   ;;  %v4032_v36 = vld [vmem:[%s5016_s6 + $0x80] sm:$0xff]  }
  0x56   : > { %3666 = vmatprep.subr.bf16.mxu1 %v4018_v28  ;;  %3594 = vmatprep.subr.bf16.mxu0 %v4020_v30 }
  0x58   : > { %3579 = vmatmul.mubr.msk.bf16.gmra.mrb[4].mxu0 %vm470_vm1, %v876_v43  ;;  %v4033_v43 = vld [vmem:[%s5017_s7 + $0x40] sm:$0xff]  }
  0x59   : > { %3667 = vmatpush3.bf16.msra.mxu1 %v4018_v28  ;;  %3586 = vmatprep.mubr.msk.bf16.mxu0 %vm470_vm1, %v4459_v46  ;;  %v3134_v46 = vpack.c.bf16 %v4544_v35, %v4486_v60  ;;  %v990_v60 = vpack.c.bf16 %v4090_v55, %v4203_v31  ;;  %v3137_v35 = vpack.c.bf16 %v1531_v59, %v4549_v42  ;;  %v4025_v31 = vld [vmem:[%s5017_s7 + $0x198] sm:$0xff]  }
  0x5a   : > { %3668 = vmatprep.subr.bf16.mxu1 %v4019_v16  ;;  %v4031_v28 = vld [vmem:[%s5017_s7 + $0x1b8] sm:$0xff]  }
  0x5d   : > { %3669 = vmatpush3.bf16.msra.mxu1 %v4019_v16  ;;  %v4034_v16 = vld [vmem:[%s5017_s7 + $0x48] sm:$0xff]  }
  0x5e   : > { %3678 = vmatprep.subr.bf16.mxu1 %v4021_v2 }
  0x60   : > { %3587 = vmatmul.mubr.msk.bf16.vlgmr.msra.gmra.mrb[0].mxu0 %vm470_vm1, %v4467_v48  ;;  %3671 = vmatmul.mubr.msk.bf16.vlgmr.msra.gmra.mrb[8].mxu1 %vm4478_vm7, %v3131_v3  ;;  %v4026_v48 = vld [vmem:[%s5016_s6 + $0x50] sm:$0xff]  }
  0x61   : > { %3595 = vmatpush3.bf16.msra.mxu0 %v4020_v30  ;;  %3679 = vmatpush3.bf16.msra.mxu1 %v4021_v2  ;;  %v5023_v30 = vpack.c.bf16 %v4383_v8, %v4379_v6  ;;  %v4035_v2 = vld [vmem:[%s5016_s6 + $0x88] sm:$0xff]   ;;  %v5024_v6 = vpack.c.bf16 %v4455_v44, %v4438_v37  ;;  %v5025_v8 = vpack.c.bf16 %v4510_v13, %v4491_v62  ;;  %v4036_v3 = vld [vmem:[%s5017_s7 + $0x50] sm:$0xff]   ;;  %v4039_v37 = vld [vmem:[%s5017_s7 + $0x80] sm:$0xff]  }
  0x62   : > { %3680 = vmatprep.subr.bf16.mxu1 %v4022_v14  ;;  %3590 = vmatprep.mubr.msk.bf16.mxu0 %vm470_vm1, %v4566_v53  ;;  %v4706_v53 = vsel %vm1094_vm3, %v2445_v39, %v2432_v56  ;;  %v4027_v56 = vld [vmem:[%s5017_s7 + $0x1a0] sm:$0xff]   ;;  %v4028_v39 = vld [vmem:[%s5017_s7 + $0x1a8] sm:$0xff]   ;;  %v3173_v44 = vpack.c.bf16 %v4090_v55, %v1531_v59  ;;  %v4037_v62 = vld [vmem:[%s5017_s7 + $0x58] sm:$0xff]   ;;  %v1998_v13 = vpack.c.bf16 %v4310_v34, %v4090_v55 }
  0x63   : > { %3596 = vmatprep.subr.bf16.mxu0 %v4023_v9  ;;  %3674 = vmatprep.mubr.msk.bf16.mxu1 %vm4478_vm7, %v3134_v46  ;;  %v3317_v42 = vpack.c.bf16 %v4706_v53, %v4626_v24  ;;  %v4045_v46 = vld [vmem:[%s5017_s7 + $0x98] sm:$0xff]   ;;  %v4048_v59 = vld [vmem:[%s5017_s7 + $0x108] sm:$0xff]   ;;  %v4080_v24 = vld [vmem:[%s5017_s7 + $0x230] sm:$0xff]  }
  0x65   : > { %3681 = vmatpush3.bf16.msra.mxu1 %v4022_v14  ;;  %3597 = vmatpush3.bf16.msra.mxu0 %v4023_v9  ;;  %v4043_v14 = vld [vmem:[%s5017_s7 + $0x90] sm:$0xff]   ;;  %v1359_v9 = vpack.c.bf16 %v4090_v55, %v4537_v23  ;;  %v4047_v23 = vld [vmem:[%s5017_s7 + $0xa0] sm:$0xff]  }
  0x66   : > { %3682 = vmatprep.subr.bf16.mxu1 %v4024_v33  ;;  %3606 = vmatprep.subr.bf16.mxu0 %v4026_v48 }
  0x68   : > { %3591 = vmatmul.mubr.msk.bf16.gmra.mrb[4].mxu0 %vm470_vm1, %v990_v60  ;;  %3675 = vmatmul.mubr.msk.bf16.gmra.mrb[12].mxu1 %vm4478_vm7, %v3137_v35  ;;  %v4050_v60 = vld [vmem:[%s5017_s7 + $0x110] sm:$0xff]  }
  0x69   : > { %3683 = vmatpush3.bf16.msra.mxu1 %v4024_v33  ;;  %3598 = vmatprep.mubr.msk.bf16.mxu0 %vm470_vm1, %v1136_v45  ;;  %v3272_v33 = vpack.c.bf16 %v4575_v5, %v4090_v55  ;;  %v4051_v35 = vld [vmem:[%s5017_s7 + $0xb0] sm:$0xff]   ;;  %v4052_v45 = vld [vmem:[%s5017_s7 + $0x118] sm:$0xff]  }
  0x6a   : > { %3684 = vmatprep.subr.bf16.mxu1 %v4025_v31  ;;  %3694 = vmatprep.mubr.msk.bf16.mxu1 %vm4478_vm7, %v4463_v47  ;;  %v4030_v47 = vld [vmem:[%s5017_s7 + $0x1b0] sm:$0xff]  }
  0x6b   : > { %v4067_v5 = vld [vmem:[%s5017_s7 + $0x170] sm:$0xff]  }
  0x6d   : > { %3685 = vmatpush3.bf16.msra.mxu1 %v4025_v31  ;;  %v4053_v31 = vld [vmem:[%s5017_s7 + $0xb8] sm:$0xff]  }
  0x6e   : > { %3686 = vmatprep.subr.bf16.mxu1 %v4027_v56 }
  0x70   : > { %3599 = vmatmul.mubr.msk.bf16.vlgmr.msra.gmra.mrb[0].mxu0 %vm470_vm1, %v4450_v41 }
  0x71   : > { %3607 = vmatpush3.bf16.msra.mxu0 %v4026_v48  ;;  %3687 = vmatpush3.bf16.msra.mxu1 %v4027_v56  ;;  %v4049_v48 = vld [vmem:[%s5017_s7 + $0xa8] sm:$0xff]   ;;  %v4054_v56 = vld [vmem:[%s5017_s7 + $0x120] sm:$0xff]  }
  0x72   : > { %3688 = vmatprep.subr.bf16.mxu1 %v4028_v39  ;;  %3602 = vmatprep.mubr.msk.bf16.mxu0 %vm470_vm1, %v4495_v4 }
  0x73   : > { %3608 = vmatprep.subr.bf16.mxu0 %v4029_v12 }
  0x75   : > { %3689 = vmatpush3.bf16.msra.mxu1 %v4028_v39  ;;  %3609 = vmatpush3.bf16.msra.mxu0 %v4029_v12  ;;  %v4055_v39 = vld [vmem:[%s5017_s7 + $0x140] sm:$0xff]   ;;  %v5027_v12 = vpack.c.bf16 %v4343_v49, %v4310_v34  ;;  %v4057_v34 = vld [vmem:[%s5017_s7 + $0x148] sm:$0xff]   ;;  %v4058_v49 = vld [vmem:[%s5017_s7 + $0x130] sm:$0xff]  }
  0x76   : > { %3690 = vmatprep.subr.bf16.mxu1 %v4030_v47  ;;  %3618 = vmatprep.subr.bf16.mxu0 %v4032_v36 }
  0x78   : > { %3603 = vmatmul.mubr.msk.bf16.gmra.mrb[4].mxu0 %vm470_vm1, %v4526_v21 }
  0x79   : > { %3691 = vmatpush3.bf16.msra.mxu1 %v4030_v47  ;;  %3610 = vmatprep.mubr.msk.bf16.mxu0 %vm470_vm1, %v5023_v30  ;;  %v4060_v30 = vld [vmem:[%s5017_s7 + $0x138] sm:$0xff]  }
  0x7a   : > { %3692 = vmatprep.subr.bf16.mxu1 %v4031_v28 }
  0x7d   : > { %3693 = vmatpush3.bf16.msra.mxu1 %v4031_v28  ;;  %v4059_v28 = vld [vmem:[%s5017_s7 + $0x150] sm:$0xff]  }
  0x7e   : > { %3702 = vmatprep.subr.bf16.mxu1 %v4033_v43 }
  0x80   : > { %3611 = vmatmul.mubr.msk.bf16.vlgmr.msra.gmra.mrb[0].mxu0 %vm470_vm1, %v5024_v6  ;;  %3695 = vmatmul.mubr.msk.bf16.vlgmr.msra.gmra.mrb[8].mxu1 %vm4478_vm7, %v4522_v20  ;;  %v4038_v20 = vld [vmem:[%s5017_s7 + $0x60] sm:$0xff]   ;;  %v4064_v6 = vld [vmem:[%s5017_s7 + $0x1c8] sm:$0xff]  }
  0x81   : > { %3619 = vmatpush3.bf16.msra.mxu0 %v4032_v36  ;;  %3703 = vmatpush3.bf16.msra.mxu1 %v4033_v43  ;;  %v4056_v36 = vld [vmem:[%s5017_s7 + $0x128] sm:$0xff]   ;;  %v4061_v43 = vld [vmem:[%s5017_s7 + $0x158] sm:$0xff]  }
  0x82   : > { %3704 = vmatprep.subr.bf16.mxu1 %v4034_v16  ;;  %3614 = vmatprep.mubr.msk.bf16.mxu0 %vm470_vm1, %v5025_v8  ;;  %v4065_v8 = vld [vmem:[%s5017_s7 + $0x168] sm:$0xff]  }
  0x83   : > { %3620 = vmatprep.subr.bf16.mxu0 %v4035_v2  ;;  %3698 = vmatprep.mubr.msk.bf16.mxu1 %vm4478_vm7, %v4570_v57  ;;  %v4040_v57 = vld [vmem:[%s5017_s7 + $0x68] sm:$0xff]  }
  0x85   : > { %3705 = vmatpush3.bf16.msra.mxu1 %v4034_v16  ;;  %3621 = vmatpush3.bf16.msra.mxu0 %v4035_v2  ;;  %v4062_v16 = vld [vmem:[%s5017_s7 + $0x1c0] sm:$0xff]  }
  0x86   : > { %3706 = vmatprep.subr.bf16.mxu1 %v4036_v3  ;;  %3774 = vmatprep.subr.bf16.mxu0 %v4039_v37  ;;  %v4063_v2 = vld [vmem:[%s5017_s7 + $0x160] sm:$0xff]  }
  0x88   : > { %3615 = vmatmul.mubr.msk.bf16.gmra.mrb[4].mxu0 %vm470_vm1, %v5026_v58  ;;  %3699 = vmatmul.mubr.msk.bf16.gmra.mrb[12].mxu1 %vm3172_vm8, %v3173_v44 }
  0x89   : > { %3707 = vmatpush3.bf16.msra.mxu1 %v4036_v3  ;;  %3622 = vmatprep.mubr.msk.bf16.mxu0 %vm470_vm1, %v4450_v41  ;;  %v4042_v41 = vld [vmem:[%s5017_s7 + $0x70] sm:$0xff]   ;;  %v5030_v3 = vpack.c.bf16 %v4403_v17, %v4352_v51  ;;  %v4068_v51 = vld [vmem:[%s5017_s7 + $0x1d8] sm:$0xff]  }
  0x8a   : > { %3708 = vmatprep.subr.bf16.mxu1 %v4037_v62  ;;  %3718 = vmatprep.mubr.bf16.mxu1 %v1998_v13  ;;  %v4069_v17 = vld [vmem:[%s5017_s7 + $0x178] sm:$0xff]  }
  0x8d   : > { %3709 = vmatpush3.bf16.msra.mxu1 %v4037_v62 }
  0x8e   : > { %3710 = vmatprep.subr.bf16.mxu1 %v4038_v20 }
  0x90   : > { %3623 = vmatmul.mubr.msk.bf16.vlgmr.msra.gmra.mrb[0].mxu0 %vm470_vm1, %v4495_v4  ;;  %v4044_v4 = vld [vmem:[%s5017_s7 + $0x78] sm:$0xff]  }
  0x91   : > { %3711 = vmatpush3.bf16.msra.mxu1 %v4038_v20  ;;  %3775 = vmatpush3.bf16.msra.mxu0 %v4039_v37 }
  0x92   : > { %3712 = vmatprep.subr.bf16.mxu1 %v4040_v57  ;;  %3776 = vmatprep.subr.bf16.mxu0 %v4041_v10 }
  0x93   : > { %3626 = vmatprep.mubr.msk.bf16.mxu0 %vm470_vm1, %v4526_v21  ;;  %v4046_v21 = vld [vmem:[%s5017_s7 + $0x100] sm:$0xff]  }
  0x95   : > { %3713 = vmatpush3.bf16.msra.mxu1 %v4040_v57  ;;  %3777 = vmatpush3.bf16.msra.mxu0 %v4041_v10 }
  0x96   : > { %3714 = vmatprep.subr.bf16.mxu1 %v4042_v41  ;;  %3778 = vmatprep.subr.bf16.mxu0 %v4043_v14 }
  0x98   : > { %3627 = vmatmul.mubr.msk.bf16.gmra.mrb[4].mxu0 %vm470_vm1, %v1359_v9 }
  0x99   : > { %3715 = vmatpush3.bf16.msra.mxu1 %v4042_v41  ;;  %3779 = vmatpush3.bf16.msra.mxu0 %v4043_v14 }
  0x9a   : > { %3716 = vmatprep.subr.bf16.mxu1 %v4044_v4  ;;  %3780 = vmatprep.subr.bf16.mxu0 %v4045_v46 }
  0x9b   : > { %3790 = vmatprep.mubr.msk.bf16.mxu0 %vm3271_vm9, %v3272_v33 }
  0x9d   : > { %3717 = vmatpush3.bf16.msra.mxu1 %v4044_v4  ;;  %3781 = vmatpush3.bf16.msra.mxu0 %v4045_v46 }
  0x9e   : > { %3726 = vmatprep.subr.bf16.mxu1 %v4046_v21  ;;  %3782 = vmatprep.subr.bf16.mxu0 %v4047_v23 }
  0xa0   : > { %3719 = vmatmul.mubr.bf16.vlgmr.msra.gmra.mrb[8].mxu1 %v4369_v1 }
  0xa1   : > { %3727 = vmatpush3.bf16.msra.mxu1 %v4046_v21  ;;  %3783 = vmatpush3.bf16.msra.mxu0 %v4047_v23 }
  0xa2   : > { %3728 = vmatprep.subr.bf16.mxu1 %v4048_v59  ;;  %3784 = vmatprep.subr.bf16.mxu0 %v4049_v48 }
  0xa3   : > { %3722 = vmatprep.mubr.bf16.mxu1 %v4422_v7 }
  0xa5   : > { %3729 = vmatpush3.bf16.msra.mxu1 %v4048_v59  ;;  %3785 = vmatpush3.bf16.msra.mxu0 %v4049_v48 }
  0xa6   : > { %3730 = vmatprep.subr.bf16.mxu1 %v4050_v60  ;;  %3786 = vmatprep.subr.bf16.mxu0 %v4051_v35 }
  0xa8   : > { %3723 = vmatmul.mubr.bf16.gmra.mrb[12].mxu1 %v4442_v40 }
  0xa9   : > { %3731 = vmatpush3.bf16.msra.mxu1 %v4050_v60  ;;  %3787 = vmatpush3.bf16.msra.mxu0 %v4051_v35 }
  0xaa   : > { %3732 = vmatprep.subr.bf16.mxu1 %v4052_v45  ;;  %3788 = vmatprep.subr.bf16.mxu0 %v4053_v31 }
  0xab   : > { %3742 = vmatprep.mubr.bf16.mxu1 %v5027_v12 }
  0xad   : > { %3733 = vmatpush3.bf16.msra.mxu1 %v4052_v45  ;;  %3789 = vmatpush3.bf16.msra.mxu0 %v4053_v31 }
  0xae   : > { %3734 = vmatprep.subr.bf16.mxu1 %v4054_v56  ;;  %3798 = vmatprep.subr.bf16.mxu0 %v4055_v39 }
  0xb0   : > { %3791 = vmatmul.mubr.msk.bf16.vlgmr.msra.gmra.mrb[8].mxu0 %vm4864_vm10, %v4595_v26 }
  0xb1   : > { %3735 = vmatpush3.bf16.msra.mxu1 %v4054_v56  ;;  %3799 = vmatpush3.bf16.msra.mxu0 %v4055_v39 }
  0xb2   : > { %3736 = vmatprep.subr.bf16.mxu1 %v4056_v36  ;;  %3800 = vmatprep.subr.bf16.mxu0 %v4057_v34 }
  0xb3   : > { %3794 = vmatprep.mubr.msk.bf16.mxu0 %vm4864_vm10, %v4615_v0 }
  0xb5   : > { %3737 = vmatpush3.bf16.msra.mxu1 %v4056_v36  ;;  %3801 = vmatpush3.bf16.msra.mxu0 %v4057_v34 }
  0xb6   : > { %3738 = vmatprep.subr.bf16.mxu1 %v4058_v49  ;;  %3802 = vmatprep.subr.bf16.mxu0 %v4059_v28 }
  0xb8   : > { %3795 = vmatmul.mubr.msk.bf16.gmra.mrb[12].mxu0 %vm4864_vm10, %v4630_v25 }
  0xb9   : > { %3739 = vmatpush3.bf16.msra.mxu1 %v4058_v49  ;;  %3803 = vmatpush3.bf16.msra.mxu0 %v4059_v28 }
  0xba   : > { %3740 = vmatprep.subr.bf16.mxu1 %v4060_v30  ;;  %3804 = vmatprep.subr.bf16.mxu0 %v4061_v43 }
  0xbb   : > { %3814 = vmatprep.mubr.msk.bf16.mxu0 %vm4864_vm10, %v3308_v22  ;;  %v4073_v22 = vld [vmem:[%s5017_s7 + $0x208] sm:$0xff]  }
  0xbd   : > { %3741 = vmatpush3.bf16.msra.mxu1 %v4060_v30  ;;  %3805 = vmatpush3.bf16.msra.mxu0 %v4061_v43 }
  0xbe   : > { %3750 = vmatprep.subr.bf16.mxu1 %v4062_v16  ;;  %3806 = vmatprep.subr.bf16.mxu0 %v4063_v2 }
  0xc0   : > { %3743 = vmatmul.mubr.bf16.vlgmr.msra.gmra.mrb[8].mxu1 %v5030_v3 }
  0xc1   : > { %3751 = vmatpush3.bf16.msra.mxu1 %v4062_v16  ;;  %3807 = vmatpush3.bf16.msra.mxu0 %v4063_v2 }
  0xc2   : > { %3752 = vmatprep.subr.bf16.mxu1 %v4064_v6  ;;  %3808 = vmatprep.subr.bf16.mxu0 %v4065_v8 }
  0xc3   : > { %3746 = vmatprep.mubr.bf16.mxu1 %v2142_v63  ;;  %v5031_v63 = vpack.c.bf16 %v4598_v27, %v4590_v11  ;;  %v4076_v11 = vld [vmem:[%s5017_s7 + $0x1f8] sm:$0xff]  }
  0xc4   : > { %v4077_v27 = vld [vmem:[%s5017_s7 + $0x218] sm:$0xff]  }
  0xc5   : > { %3753 = vmatpush3.bf16.msra.mxu1 %v4064_v6  ;;  %3809 = vmatpush3.bf16.msra.mxu0 %v4065_v8 }
  0xc6   : > { %3754 = vmatprep.subr.bf16.mxu1 %v4066_v15  ;;  %3810 = vmatprep.subr.bf16.mxu0 %v4067_v5 }
  0xc8   : > { %3747 = vmatmul.mubr.bf16.gmra.mrb[12].mxu1 %v2143_v54  ;;  %v4075_v54 = vld [vmem:[%s5017_s7 + $0x210] sm:$0xff]  }
  0xc9   : > { %3755 = vmatpush3.bf16.msra.mxu1 %v4066_v15  ;;  %3811 = vmatpush3.bf16.msra.mxu0 %v4067_v5 }
  0xca   : > { %3756 = vmatprep.subr.bf16.mxu1 %v4068_v51  ;;  %3812 = vmatprep.subr.bf16.mxu0 %v4069_v17 }
  0xcb   : > { %3766 = vmatprep.mubr.bf16.mxu1 %v4369_v1  ;;  %v4074_v1 = vld [vmem:[%s5017_s7 + $0x1f0] sm:$0xff]  }
  0xcd   : > { %3757 = vmatpush3.bf16.msra.mxu1 %v4068_v51  ;;  %3813 = vmatpush3.bf16.msra.mxu0 %v4069_v17 }
  0xce   : > { %3758 = vmatprep.subr.bf16.mxu1 %v4070_v19  ;;  %3822 = vmatprep.subr.bf16.mxu0 %v4071_v29 }
  0xd0   : > { %3815 = vmatmul.mubr.msk.bf16.vlgmr.msra.gmra.mrb[8].mxu0 %vm4864_vm10, %v5031_v63 }
  0xd1   : > { %3759 = vmatpush3.bf16.msra.mxu1 %v4070_v19  ;;  %3823 = vmatpush3.bf16.msra.mxu0 %v4071_v29 }
  0xd2   : > { %3760 = vmatprep.subr.bf16.mxu1 %v4072_v32  ;;  %3824 = vmatprep.subr.bf16.mxu0 %v4073_v22 }
  0xd3   : > { %3818 = vmatprep.mubr.msk.bf16.mxu0 %vm4864_vm10, %v3314_v61  ;;  %v4081_v61 = vld [vmem:[%s5017_s7 + $0x238] sm:$0xff]  }
  0xd5   : > { %3761 = vmatpush3.bf16.msra.mxu1 %v4072_v32  ;;  %3825 = vmatpush3.bf16.msra.mxu0 %v4073_v22 }
  0xd6   : > { %3762 = vmatprep.subr.bf16.mxu1 %v4074_v1  ;;  %3826 = vmatprep.subr.bf16.mxu0 %v4075_v54 }
  0xd8   : > { %3819 = vmatmul.mubr.msk.bf16.gmra.mrb[12].mxu0 %vm4864_vm10, %v3317_v42 }
  0xd9   : > { %3763 = vmatpush3.bf16.msra.mxu1 %v4074_v1  ;;  %3827 = vmatpush3.bf16.msra.mxu0 %v4075_v54 }
  0xda   : > { %3764 = vmatprep.subr.bf16.mxu1 %v4076_v11  ;;  %3828 = vmatprep.subr.bf16.mxu0 %v4077_v27 }
  0xdb   : > { %3838 = vmatprep.mubr.msk.bf16.mxu0 %vm4864_vm10, %v4595_v26  ;;  %v2293_v26 = vpack.c.bf16 %v4090_v55, %v4319_v38  ;;  %v3353_v38 = vpack.c.bf16 %v4090_v55, %v4706_v53 }
  0xdd   : > { %3765 = vmatpush3.bf16.msra.mxu1 %v4076_v11  ;;  %3829 = vmatpush3.bf16.msra.mxu0 %v4077_v27 }
  0xde   : > { %3830 = vmatprep.subr.bf16.mxu0 %v4078_v52 }
  0xe0   : > { %3767 = vmatmul.mubr.bf16.vlgmr.msra.gmra.mrb[8].mxu1 %v4422_v7 }
  0xe1   : > { %3831 = vmatpush3.bf16.msra.mxu0 %v4078_v52  ;;  %3770 = vmatprep.mubr.bf16.mxu1 %v4442_v40 }
  0xe2   : > { %3832 = vmatprep.subr.bf16.mxu0 %v4079_v50 }
  0xe5   : > { %3833 = vmatpush3.bf16.msra.mxu0 %v4079_v50 }
  0xe6   : > { %3834 = vmatprep.subr.bf16.mxu0 %v4080_v24 }
  0xe8   : > { %3771 = vmatmul.mubr.bf16.gmra.mrb[12].mxu1 %v2293_v26 }
  0xe9   : > { %3835 = vmatpush3.bf16.msra.mxu0 %v4080_v24 }
  0xea   : > { %3836 = vmatprep.subr.bf16.mxu0 %v4081_v61 }
  0xed   : > { %3837 = vmatpush3.bf16.msra.mxu0 %v4081_v61 }
  0xf0   : > { %3839 = vmatmul.mubr.msk.bf16.vlgmr.msra.gmra.mrb[8].mxu0 %vm4864_vm10, %v4615_v0 }
  0xf1   : > { %3842 = vmatprep.mubr.msk.bf16.mxu0 %vm4864_vm10, %v4630_v25 }
  0xf3   : > { %v3528_v7 = vpop.f32.mrb[0].mxu1 }
  0xf4   : > { %v517_v40 = vpop.f32.mrb[1].mxu1 }
  0xf5   : > { %v3529_v42 = vpop.f32.mrb[2].mxu1 }
  0xf6   : > { %v520_v37 = vpop.f32.mrb[3].mxu1 }
  0xf8   : > { %3843 = vmatmul.mubr.msk.bf16.gmra.mrb[12].mxu0 %vm3352_vm11, %v3353_v38 }
  0xfb   : > { %v3532_v44 = vpop.f32.mrb[4].mxu1 }
  0xfc   : > { %v533_v62 = vpop.f32.mrb[5].mxu1 }
  0xfd   : > { %v3533_v13 = vpop.f32.mrb[6].mxu1 }
  0xfe   : > { %v536_v0 = vpop.f32.mrb[7].mxu1 }
 0x163   : > { %v3624_v58 = vpop.f32.mrb[0].mxu0 }
 0x164   : > { %v3846_v20 = vadd.f32 %v3624_v58, %v3528_v7  ;;  %v1423_v57 = vpop.f32.mrb[1].mxu0 }
 0x165   : > { %v3849_v25 = vadd.f32 %v1423_v57, %v517_v40  ;;  %v3625_v10 = vpop.f32.mrb[2].mxu0 }
 0x166   : > { %v3852_v41 = vadd.f32 %v3625_v10, %v3529_v42  ;;  %v1426_v14 = vpop.f32.mrb[3].mxu0 }
 0x167   : > { %v3855_v55 = vadd.f32 %v1426_v14, %v520_v37 }
 0x16b   : > { %v3628_v53 = vpop.f32.mrb[4].mxu0 }
 0x16c   : > { %v3858_v9 = vadd.f32 %v3628_v53, %v3532_v44  ;;  %v1439_v18 = vpop.f32.mrb[5].mxu0 }
 0x16d   : > { %v3861_v4 = vadd.f32 %v1439_v18, %v533_v62  ;;  %v3629_v46 = vpop.f32.mrb[6].mxu0 }
 0x16e   : > { %v3864_v33 = vadd.f32 %v3629_v46, %v3533_v13  ;;  %v1442_v21 = vpop.f32.mrb[7].mxu0 }
 0x16f   : > { %v3867_v23 = vadd.f32 %v1442_v21, %v536_v0 }
 0x1b3   : > { %v3768_v59 = vpop.f32.mrb[8].mxu1 }
 0x1b4   : > { %v3847_v48 = vadd.f32 %v3846_v20, %v3768_v59  ;;  %v2393_v60 = vpop.f32.mrb[9].mxu1 }
 0x1b5   : > { %v3850_v35 = vadd.f32 %v3849_v25, %v2393_v60  ;;  %v3769_v45 = vpop.f32.mrb[10].mxu1 }
 0x1b6   : > { %v3853_v31 = vadd.f32 %v3852_v41, %v3769_v45  ;;  %v2396_v56 = vpop.f32.mrb[11].mxu1 }
 0x1b7   : > { %v3856_v39 = vadd.f32 %v3855_v55, %v2396_v56 }
 0x1bb   : > { %v3772_v12 = vpop.f32.mrb[12].mxu1 }
 0x1bc   : > { %v3859_v47 = vadd.f32 %v3858_v9, %v3772_v12  ;;  %v2409_v36 = vpop.f32.mrb[13].mxu1 }
 0x1bd   : > { %v3862_v34 = vadd.f32 %v3861_v4, %v2409_v36  ;;  %v3773_v49 = vpop.f32.mrb[14].mxu1 }
 0x1be   : > { %v3865_v28 = vadd.f32 %v3864_v33, %v3773_v49  ;;  %v2412_v30 = vpop.f32.mrb[15].mxu1 }
 0x1bf   : > { %v3868_v43 = vadd.f32 %v3867_v23, %v2412_v30 }
 0x1c3   : > { %v3840_v16 = vpop.f32.mrb[8].mxu0 }
 0x1c4   : > { %v3848_v2 = vadd.f32 %v3847_v48, %v3840_v16  ;;  %v2868_v6 = vpop.f32.mrb[9].mxu0 }
 0x1c5   : > { %v3851_v8 = vadd.f32 %v3850_v35, %v2868_v6  ;;  %v3841_v3 = vpop.f32.mrb[10].mxu0 }
 0x1c6   : > { %2909 = vst [vmem:[%s325_s24 + $0x10] sm:$0xff] %v3848_v2  ;;  %v3854_v15 = vadd.f32 %v3853_v31, %v3841_v3  ;;  %v2871_v5 = vpop.f32.mrb[11].mxu0 }
 0x1c7   : > { %2907 = vst [vmem:[%s325_s24] sm:$0xff] %v3851_v8  ;;  %v3857_v51 = vadd.f32 %v3856_v39, %v2871_v5 }
 0x1c8   : > { %2910 = vst [vmem:[%s325_s24 + $0x18] sm:$0xff] %v3854_v15 }
 0x1c9   : > { %2908 = vst [vmem:[%s325_s24 + $0x8] sm:$0xff] %v3857_v51 }
 0x1cb   : > { %v3844_v17 = vpop.f32.mrb[12].mxu0 }
 0x1cc   : > { %v3860_v19 = vadd.f32 %v3859_v47, %v3844_v17  ;;  %v2884_v29 = vpop.f32.mrb[13].mxu0 }
 0x1cd   : > { %v3863_v32 = vadd.f32 %v3862_v34, %v2884_v29  ;;  %v3845_v22 = vpop.f32.mrb[14].mxu0 }
 0x1ce   : > { %2913 = vst [vmem:[%s325_s24 + $0x30] sm:$0xff] %v3860_v19  ;;  %v3866_v63 = vadd.f32 %v3865_v28, %v3845_v22  ;;  %v2887_v1 = vpop.f32.mrb[15].mxu0 }
 0x1cf   : > { %2911 = vst [vmem:[%s325_s24 + $0x20] sm:$0xff] %v3863_v32  ;;  %v3869_v54 = vadd.f32 %v3868_v43, %v2887_v1 }
 0x1d0   : > { %2914 = vst [vmem:[%s325_s24 + $0x38] sm:$0xff] %v3866_v63 }
 0x1d1   : > { %2912 = vst [vmem:[%s325_s24 + $0x28] sm:$0xff] %v3869_v54 }
 0x1d2 PF: > { %s18_s27 = sadd.s32 1, %s4088_s27  }
 0x1d3   : > { %p15_p4 = scmp.ge.s32.totalorder %s18_s27, 4  }
 0x1d5   :  { %17 = sbr.rel (!%p15_p4) target bundleno = 1 (0x1), region = 101 }

</bundles_post_ra>
